<compile_context>
chip_gen: v7x
topology: tpu7x:2x2x1
jax: 0.10.0
libtpu: 0.0.40
codegen_flags: <defaults>
</compile_context>

<pallas_src>
import functools

import jax
import jax.numpy as jnp
from jax.experimental import pallas as pl
from jax.experimental.pallas import tpu as pltpu

EPS = 1e-5
DILATIONS = (1, 3, 6, 9)
VMEM_LIMIT = 32 * 1024 * 1024   # safe on v5e/v6e/v7x; v6e could go higher
TILE_M_CAP = 2048               # ~1-2 MB double-buffered blocks at this size
MIN_GRID_STEPS = 4              # even, >=4 steps -> v7x megacore stays pipelined


# ----------------------------- Pallas kernels ------------------------------

def conv_stats_kernel(p_ref, w_ref, cb_ref, acc_ref, s_ref, ss_ref, *, m_valid):
    """Pass 1: fused (block-diagonal) 4-branch dilated-conv matmul + bias,
    plus per-tile column sum / sum-of-squares for the stage-1 batch norm.
    Rows >= m_valid (M padding) are masked out of the statistics."""
    tile_m = acc_ref.shape[0]
    acc = jnp.dot(p_ref[...], w_ref[...], preferred_element_type=jnp.float32)
    acc = acc + cb_ref[...]
    acc_ref[...] = acc.astype(acc_ref.dtype)
    rows = (jax.lax.broadcasted_iota(jnp.int32, (tile_m, 1), 0)
            + pl.program_id(0) * tile_m)
    accv = acc * (rows < m_valid).astype(jnp.float32)
    s_ref[...] = jnp.broadcast_to(
        jnp.sum(accv, axis=0, keepdims=True), s_ref.shape)
    ss_ref[...] = jnp.broadcast_to(
        jnp.sum(accv * acc, axis=0, keepdims=True), ss_ref.shape)


def bn_relu_matmul_stats_kernel(a_ref, s1_ref, t1_ref, w_ref, cb_ref,
                                acc_ref, s_ref, ss_ref, *, m_valid):
    """Pass 2: stage-1 BN (folded scale/shift) + ReLU fused with the 1x1
    head-conv matmul + bias, plus per-tile stats for the stage-2 batch norm."""
    tile_m = acc_ref.shape[0]
    y1 = jnp.maximum(
        a_ref[...].astype(jnp.float32) * s1_ref[...] + t1_ref[...], 0.0)
    acc = jnp.dot(y1.astype(jnp.bfloat16), w_ref[...],
                  preferred_element_type=jnp.float32)
    acc = acc + cb_ref[...]
    acc_ref[...] = acc.astype(acc_ref.dtype)
    rows = (jax.lax.broadcasted_iota(jnp.int32, (tile_m, 1), 0)
            + pl.program_id(0) * tile_m)
    accv = acc * (rows < m_valid).astype(jnp.float32)
    s_ref[...] = jnp.broadcast_to(
        jnp.sum(accv, axis=0, keepdims=True), s_ref.shape)
    ss_ref[...] = jnp.broadcast_to(
        jnp.sum(accv * acc, axis=0, keepdims=True), ss_ref.shape)


def bn_relu_kernel(a_ref, s_ref, t_ref, o_ref):
    """Pass 3: stage-2 BN (folded scale/shift) + ReLU."""
    o_ref[...] = jnp.maximum(
        a_ref[...].astype(jnp.float32) * s_ref[...] + t_ref[...], 0.0
    ).astype(o_ref.dtype)


# ------------------------------ glue (plain JAX) ---------------------------

def _rup(x, mult):
    return ((x + mult - 1) // mult) * mult


def _choose_tiling(m, cap=TILE_M_CAP, min_steps=MIN_GRID_STEPS):
    """Tile size (multiple of 16 for bf16 sublane packing), number of grid
    steps (even, >= min_steps when possible), and padded M."""
    tile = max(16, min(cap, _rup(-(-m // min_steps), 16)))
    nt = -(-m // tile)
    if nt % 2:
        nt += 1
    return tile, nt, nt * tile


def _im2col_3x3_dilated(x_nhwc, d):
    """(N,H,W,C) -> (N*H*W, 9*C) patches for a 3x3 'same' conv, dilation d."""
    n, h, w, c = x_nhwc.shape
    xp = jnp.pad(x_nhwc, ((0, 0), (d, d), (d, d), (0, 0)))
    cols = [xp[:, ky * d:ky * d + h, kx * d:kx * d + w, :]
            for ky in range(3) for kx in range(3)]
    return jnp.concatenate(cols, axis=-1).reshape(n * h * w, 9 * c)


def _w3x3_to_mat(w_oihw):
    """(Cout,Cin,3,3) -> (9*Cin, Cout), tap order (ky,kx,cin) matching im2col."""
    return jnp.transpose(w_oihw, (2, 3, 1, 0)).reshape(-1, w_oihw.shape[0])


def _fold_bn(sums, sumsq, nt, m, gamma, beta):
    """Fold batch statistics into per-channel scale/shift (training-mode BN)."""
    mu = sums.reshape(nt, 8, -1)[:, 0].sum(axis=0) / m
    ex2 = sumsq.reshape(nt, 8, -1)[:, 0].sum(axis=0) / m
    var = jnp.maximum(ex2 - mu * mu, 0.0)
    scale = gamma * jax.lax.rsqrt(var + EPS)
    shift = beta - mu * scale
    return scale.reshape(1, -1), shift.reshape(1, -1)


def dilated_conv_forward(x_nchw, params):
    n, cin, h, w = x_nchw.shape
    cout = params["w5"].shape[0]
    nb = len(DILATIONS)
    m = n * h * w

    kb = 9 * cin          # per-branch contraction size
    k1 = nb * kb          # fused contraction width (no 256 padding)
    c1 = nb * cout        # concat width, unpadded
    c2 = cout             # head width, unpadded

    tile_m, nt, m_pad = _choose_tiling(m)

    # NHWC, bf16 before patch formation (halves XLA-side im2col traffic).
    x = jnp.transpose(x_nchw, (0, 2, 3, 1)).astype(jnp.bfloat16)

    # --- stage-1 operands: fused 4-branch patches + block-diagonal weights ---
    p1 = jnp.concatenate([_im2col_3x3_dilated(x, d) for d in DILATIONS], axis=-1)
    p1 = jnp.pad(p1, ((0, m_pad - m), (0, 0)))               # row padding only

    w1 = jnp.zeros((k1, c1), jnp.float32)
    for i in range(nb):
        w1 = w1.at[i * kb:(i + 1) * kb, i * cout:(i + 1) * cout].set(
            _w3x3_to_mat(params[f"w{i}"]))
    w1 = w1.astype(jnp.bfloat16)
    cb1 = jnp.concatenate([params[f"cb{i}"] for i in range(nb)])
    g1 = jnp.concatenate([params[f"g{i}"] for i in range(nb)])
    b1 = jnp.concatenate([params[f"b{i}"] for i in range(nb)])

    compiler_params = pltpu.CompilerParams(
        dimension_semantics=("parallel",), vmem_limit_bytes=VMEM_LIMIT)

    # --- pass 1: branch convs (one wide-K matmul) + BN statistics ------------
    acc1, s1, ss1 = pl.pallas_call(
        functools.partial(conv_stats_kernel, m_valid=m),
        out_shape=(jax.ShapeDtypeStruct((m_pad, c1), jnp.bfloat16),
                   jax.ShapeDtypeStruct((nt * 8, c1), jnp.float32),
                   jax.ShapeDtypeStruct((nt * 8, c1), jnp.float32)),
        grid=(nt,),
        in_specs=[pl.BlockSpec((tile_m, k1), lambda i: (i, 0)),
                  pl.BlockSpec((k1, c1), lambda i: (0, 0)),
                  pl.BlockSpec((1, c1), lambda i: (0, 0))],
        out_specs=(pl.BlockSpec((tile_m, c1), lambda i: (i, 0)),
                   pl.BlockSpec((8, c1), lambda i: (i, 0)),
                   pl.BlockSpec((8, c1), lambda i: (i, 0))),
        compiler_params=compiler_params,
        cost_estimate=pl.CostEstimate(
            flops=2 * m_pad * k1 * c1, transcendentals=0,
            bytes_accessed=p1.size * 2 + w1.size * 2 + m_pad * c1 * 2),
    )(p1, w1, cb1.reshape(1, -1))

    scale1, shift1 = _fold_bn(s1, ss1, nt, m, g1, b1)

    # --- stage-2 operands: 1x1 head-conv weights (unpadded) -------------------
    w5 = params["w5"][:, :, 0, 0].T.astype(jnp.bfloat16)      # (c1, cout)
    cb5, g5, b5 = params["cb5"], params["g5"], params["b5"]

    # --- pass 2: stage-1 BN+ReLU fused with 1x1 conv + stage-2 BN stats ------
    acc2, s2, ss2 = pl.pallas_call(
        functools.partial(bn_relu_matmul_stats_kernel, m_valid=m),
        out_shape=(jax.ShapeDtypeStruct((m_pad, c2), jnp.bfloat16),
                   jax.ShapeDtypeStruct((nt * 8, c2), jnp.float32),
                   jax.ShapeDtypeStruct((nt * 8, c2), jnp.float32)),
        grid=(nt,),
        in_specs=[pl.BlockSpec((tile_m, c1), lambda i: (i, 0)),
                  pl.BlockSpec((1, c1), lambda i: (0, 0)),
                  pl.BlockSpec((1, c1), lambda i: (0, 0)),
                  pl.BlockSpec((c1, c2), lambda i: (0, 0)),
                  pl.BlockSpec((1, c2), lambda i: (0, 0))],
        out_specs=(pl.BlockSpec((tile_m, c2), lambda i: (i, 0)),
                   pl.BlockSpec((8, c2), lambda i: (i, 0)),
                   pl.BlockSpec((8, c2), lambda i: (i, 0))),
        compiler_params=compiler_params,
        cost_estimate=pl.CostEstimate(
            flops=2 * m_pad * c1 * c2, transcendentals=0,
            bytes_accessed=m_pad * c1 * 2 + w5.size * 2 + m_pad * c2 * 2),
    )(acc1, scale1, shift1, w5, cb5.reshape(1, -1))

    scale2, shift2 = _fold_bn(s2, ss2, nt, m, g5, b5)

    # --- pass 3: stage-2 BN + ReLU --------------------------------------------
    out = pl.pallas_call(
        bn_relu_kernel,
        out_shape=jax.ShapeDtypeStruct((m_pad, c2), jnp.float32),
        grid=(nt,),
        in_specs=[pl.BlockSpec((tile_m, c2), lambda i: (i, 0)),
                  pl.BlockSpec((1, c2), lambda i: (0, 0)),
                  pl.BlockSpec((1, c2), lambda i: (0, 0))],
        out_specs=pl.BlockSpec((tile_m, c2), lambda i: (i, 0)),
        compiler_params=compiler_params,
        cost_estimate=pl.CostEstimate(
            flops=3 * m_pad * c2, transcendentals=0,
            bytes_accessed=m_pad * c2 * 2 + m_pad * c2 * 4),
    )(acc2, scale2, shift2)

    out = out[:m].reshape(n, h, w, cout)
    return jnp.transpose(out, (0, 3, 1, 2))                   # back to NCHW


# ------------------------------ pure-JAX reference -------------------------

def reference_forward(x, params):
    hi = jax.lax.Precision.HIGHEST

    def conv(xx, ww, bb, pad, dil):
        y = jax.lax.conv_general_dilated(
            xx, ww, (1, 1), [(pad, pad), (pad, pad)], rhs_dilation=(dil, dil),
            dimension_numbers=("NCHW", "OIHW", "NCHW"), precision=hi)
        return y + bb.reshape(1, -1, 1, 1)

    def bn(xx, g, b):
        mu = jnp.mean(xx, axis=(0, 2, 3), keepdims=True)
        var = jnp.mean((xx - mu) ** 2, axis=(0, 2, 3), keepdims=True)
        return (xx - mu) * jax.lax.rsqrt(var + EPS) * g.reshape(1, -1, 1, 1) \
            + b.reshape(1, -1, 1, 1)

    ys = []
    for i, d in enumerate(DILATIONS):
        yi = jax.nn.relu(bn(conv(x, params[f"w{i}"], params[f"cb{i}"], d, d),
                            params[f"g{i}"], params[f"b{i}"]))
        ys.append(yi)
    xc = jnp.concatenate(ys, axis=1)
    y5 = bn(conv(xc, params["w5"], params["cb5"], 0, 1),
            params["g5"], params["b5"])
    return jax.nn.relu(y5)


# ----------------------------------- main -----------------------------------

if __name__ == "__main__":
    key = jax.random.PRNGKey(0)
    N, IN_C, OUT_C, H, W = 2, 4, 8, 16, 16
    ks = iter(jax.random.split(key, 32))
    x = jax.random.normal(next(ks), (N, IN_C, H, W), jnp.float32)

    # Deterministic synthetic parameters (shapes match the PyTorch module).
    # TODO(synk): BatchNorm running-stat (moving mean/var) buffer updates are
    # side effects of the PyTorch module and are not modeled here.
    params = {}
    for i in range(4):
        params[f"w{i}"] = 0.2 * jax.random.normal(next(ks), (OUT_C, IN_C, 3, 3), jnp.float32)
        params[f"cb{i}"] = 0.1 * jax.random.normal(next(ks), (OUT_C,), jnp.float32)
        params[f"g{i}"] = 1.0 + 0.1 * jax.random.normal(next(ks), (OUT_C,), jnp.float32)
        params[f"b{i}"] = 0.1 * jax.random.normal(next(ks), (OUT_C,), jnp.float32)
    params["w5"] = 0.2 * jax.random.normal(next(ks), (OUT_C, 4 * OUT_C, 1, 1), jnp.float32)
    params["cb5"] = 0.1 * jax.random.normal(next(ks), (OUT_C,), jnp.float32)
    params["g5"] = 1.0 + 0.1 * jax.random.normal(next(ks), (OUT_C,), jnp.float32)
    params["b5"] = 0.1 * jax.random.normal(next(ks), (OUT_C,), jnp.float32)

    out = jax.block_until_ready(jax.jit(dilated_conv_forward)(x, params))
    assert out.shape == (N, OUT_C, H, W), out.shape

    ref = jax.block_until_ready(reference_forward(x, params))
    max_err = float(jnp.max(jnp.abs(out - ref)))
    rel_err = float(jnp.linalg.norm(out - ref) / (jnp.linalg.norm(ref) + 1e-12))
    # bf16 MXU matmuls / bf16 inter-pass activations vs. an f32 HIGHEST reference
    if not (max_err < 5e-2 and rel_err < 2e-2):
        raise AssertionError(
            f"mismatch: max abs err = {max_err:.4e}, rel fro err = {rel_err:.4e}")
    print("KERNEL_OK")
</pallas_src>

<mosaic_0001>
module attributes {stable_mosaic.version = 11 : i64} {
  func.func @conv_stats_kernel(%arg0: i32, %arg1: memref<128x144xbf16, #tpu.memory_space<vmem>>, %arg2: memref<144x32xbf16, #tpu.memory_space<vmem>>, %arg3: memref<1x32xf32, #tpu.memory_space<vmem>>, %arg4: memref<128x32xbf16, #tpu.memory_space<vmem>>, %arg5: memref<8x32xf32, #tpu.memory_space<vmem>>, %arg6: memref<8x32xf32, #tpu.memory_space<vmem>>) attributes {dimension_semantics = [#tpu.dimension_semantics<parallel>], iteration_bounds = array<i64: 4>, scalar_prefetch = 0 : i64, scratch_operands = 0 : i64, tpu.core_type = #tpu.core_type<tc>, window_params = [{transform_indices = @transform_0, window_bounds = array<i64: 128, 144>}, {pipeline_mode = #tpu.pipeline_mode<synchronous>, transform_indices = @transform_1, window_bounds = array<i64: 144, 32>}, {pipeline_mode = #tpu.pipeline_mode<synchronous>, transform_indices = @transform_2, window_bounds = array<i64: 1, 32>}, {transform_indices = @transform_3, window_bounds = array<i64: 128, 32>}, {transform_indices = @transform_4, window_bounds = array<i64: 8, 32>}, {transform_indices = @transform_5, window_bounds = array<i64: 8, 32>}]} {
    %c0 = arith.constant 0 : index
    %c0_0 = arith.constant 0 : index
    %0 = vector.load %arg1[%c0, %c0_0] : memref<128x144xbf16, #tpu.memory_space<vmem>>, vector<128x144xbf16>
    %c0_1 = arith.constant 0 : index
    %c0_2 = arith.constant 0 : index
    %1 = vector.load %arg2[%c0_1, %c0_2] : memref<144x32xbf16, #tpu.memory_space<vmem>>, vector<144x32xbf16>
    %cst = arith.constant dense<0.000000e+00> : vector<128x32xf32>
    %2 = tpu.matmul %0, %1, %cst {dimension_numbers = #tpu.dot_dimension_numbers<[1], [0], [0], [1], [0, 0, 1, 1], [], []>} : vector<128x144xbf16>, vector<144x32xbf16>, vector<128x32xf32> -> vector<128x32xf32>
    %c0_3 = arith.constant 0 : index
    %c0_4 = arith.constant 0 : index
    %3 = vector.load %arg3[%c0_3, %c0_4] : memref<1x32xf32, #tpu.memory_space<vmem>>, vector<1x32xf32>
    %4 = vector.broadcast %3 : vector<1x32xf32> to vector<128x32xf32>
    %5 = arith.addf %2, %4 : vector<128x32xf32>
    %6 = arith.truncf %5 : vector<128x32xf32> to vector<128x32xbf16>
    %c0_5 = arith.constant 0 : index
    %c0_6 = arith.constant 0 : index
    %7 = vector.load %arg4[%c0_5, %c0_6] : memref<128x32xbf16, #tpu.memory_space<vmem>>, vector<128x32xbf16>
    tpu.vector_store %arg4[%c0_5, %c0_6], %6 {strides = array<i32>} : memref<128x32xbf16, #tpu.memory_space<vmem>>, vector<128x32xbf16>,
    %8 = tpu.iota {dimensions = array<i32: 0>} : vector<128x1xi32>
    %c128_i32 = arith.constant 128 : i32
    %9 = arith.muli %arg0, %c128_i32 : i32
    %10 = vector.broadcast %9 : i32 to vector<128x1xi32>
    %11 = arith.addi %8, %10 : vector<128x1xi32>
    %c512_i32 = arith.constant 512 : i32
    %12 = vector.broadcast %c512_i32 : i32 to vector<128x1xi32>
    %13 = arith.cmpi slt, %11, %12 : vector<128x1xi32>
    %14 = arith.extui %13 : vector<128x1xi1> to vector<128x1xi32>
    %15 = arith.sitofp %14 : vector<128x1xi32> to vector<128x1xf32>
    %16 = vector.broadcast %15 : vector<128x1xf32> to vector<128x32xf32>
    %17 = arith.mulf %5, %16 : vector<128x32xf32>
    %cst_7 = arith.constant dense<0.000000e+00> : vector<32xf32>
    %18 = vector.multi_reduction <add>, %17, %cst_7 [0] : vector<128x32xf32> to vector<32xf32>
    %19 = vector.shape_cast %18 : vector<32xf32> to vector<1x32xf32>
    %20 = vector.shape_cast %19 : vector<1x32xf32> to vector<1x32xf32>
    %21 = vector.broadcast %20 : vector<1x32xf32> to vector<8x32xf32>
    %c0_8 = arith.constant 0 : index
    %c0_9 = arith.constant 0 : index
    %22 = vector.load %arg5[%c0_8, %c0_9] : memref<8x32xf32, #tpu.memory_space<vmem>>, vector<8x32xf32>
    tpu.vector_store %arg5[%c0_8, %c0_9], %21 {strides = array<i32>} : memref<8x32xf32, #tpu.memory_space<vmem>>, vector<8x32xf32>,
    %23 = arith.mulf %17, %5 : vector<128x32xf32>
    %cst_10 = arith.constant dense<0.000000e+00> : vector<32xf32>
    %24 = vector.multi_reduction <add>, %23, %cst_10 [0] : vector<128x32xf32> to vector<32xf32>
    %25 = vector.shape_cast %24 : vector<32xf32> to vector<1x32xf32>
    %26 = vector.shape_cast %25 : vector<1x32xf32> to vector<1x32xf32>
    %27 = vector.broadcast %26 : vector<1x32xf32> to vector<8x32xf32>
    %c0_11 = arith.constant 0 : index
    %c0_12 = arith.constant 0 : index
    %28 = vector.load %arg6[%c0_11, %c0_12] : memref<8x32xf32, #tpu.memory_space<vmem>>, vector<8x32xf32>
    tpu.vector_store %arg6[%c0_11, %c0_12], %27 {strides = array<i32>} : memref<8x32xf32, #tpu.memory_space<vmem>>, vector<8x32xf32>,
    return
  }
  func.func @transform_0(%arg0: i32) -> (i32, i32) {
    %c0_i32 = arith.constant 0 : i32
    %c0_i32_0 = arith.constant 0 : i32
    return %arg0, %c0_i32 : i32, i32
  }
  func.func @transform_1(%arg0: i32) -> (i32, i32) {
    %c0_i32 = arith.constant 0 : i32
    %c0_i32_0 = arith.constant 0 : i32
    %c0_i32_1 = arith.constant 0 : i32
    return %c0_i32, %c0_i32_0 : i32, i32
  }
  func.func @transform_2(%arg0: i32) -> (i32, i32) {
    %c0_i32 = arith.constant 0 : i32
    %c0_i32_0 = arith.constant 0 : i32
    %c0_i32_1 = arith.constant 0 : i32
    return %c0_i32, %c0_i32_0 : i32, i32
  }
  func.func @transform_3(%arg0: i32) -> (i32, i32) {
    %c0_i32 = arith.constant 0 : i32
    %c0_i32_0 = arith.constant 0 : i32
    return %arg0, %c0_i32 : i32, i32
  }
  func.func @transform_4(%arg0: i32) -> (i32, i32) {
    %c0_i32 = arith.constant 0 : i32
    %c0_i32_0 = arith.constant 0 : i32
    return %arg0, %c0_i32 : i32, i32
  }
  func.func @transform_5(%arg0: i32) -> (i32, i32) {
    %c0_i32 = arith.constant 0 : i32
    %c0_i32_0 = arith.constant 0 : i32
    return %arg0, %c0_i32 : i32, i32
  }
}

module attributes {stable_mosaic.version = 11 : i64} {
  func.func @bn_relu_kernel(%arg0: i32, %arg1: memref<128x8xbf16, #tpu.memory_space<vmem>>, %arg2: memref<1x8xf32, #tpu.memory_space<vmem>>, %arg3: memref<1x8xf32, #tpu.memory_space<vmem>>, %arg4: memref<128x8xf32, #tpu.memory_space<vmem>>) attributes {dimension_semantics = [#tpu.dimension_semantics<parallel>], iteration_bounds = array<i64: 4>, scalar_prefetch = 0 : i64, scratch_operands = 0 : i64, tpu.core_type = #tpu.core_type<tc>, window_params = [{transform_indices = @transform_0, window_bounds = array<i64: 128, 8>}, {pipeline_mode = #tpu.pipeline_mode<synchronous>, transform_indices = @transform_1, window_bounds = array<i64: 1, 8>}, {pipeline_mode = #tpu.pipeline_mode<synchronous>, transform_indices = @transform_2, window_bounds = array<i64: 1, 8>}, {transform_indices = @transform_3, window_bounds = array<i64: 128, 8>}]} {
    %c0 = arith.constant 0 : index
    %c0_0 = arith.constant 0 : index
    %0 = vector.load %arg1[%c0, %c0_0] : memref<128x8xbf16, #tpu.memory_space<vmem>>, vector<128x8xbf16>
    %1 = arith.extf %0 : vector<128x8xbf16> to vector<128x8xf32>
    %c0_1 = arith.constant 0 : index
    %c0_2 = arith.constant 0 : index
    %2 = vector.load %arg2[%c0_1, %c0_2] : memref<1x8xf32, #tpu.memory_space<vmem>>, vector<1x8xf32>
    %3 = vector.broadcast %2 : vector<1x8xf32> to vector<128x8xf32>
    %4 = arith.mulf %1, %3 : vector<128x8xf32>
    %c0_3 = arith.constant 0 : index
    %c0_4 = arith.constant 0 : index
    %5 = vector.load %arg3[%c0_3, %c0_4] : memref<1x8xf32, #tpu.memory_space<vmem>>, vector<1x8xf32>
    %6 = vector.broadcast %5 : vector<1x8xf32> to vector<128x8xf32>
    %7 = arith.addf %4, %6 : vector<128x8xf32>
    %cst = arith.constant 0.000000e+00 : f32
    %8 = vector.broadcast %cst : f32 to vector<128x8xf32>
    %9 = arith.maximumf %7, %8 : vector<128x8xf32>
    %c0_5 = arith.constant 0 : index
    %c0_6 = arith.constant 0 : index
    %10 = vector.load %arg4[%c0_5, %c0_6] : memref<128x8xf32, #tpu.memory_space<vmem>>, vector<128x8xf32>
    tpu.vector_store %arg4[%c0_5, %c0_6], %9 {strides = array<i32>} : memref<128x8xf32, #tpu.memory_space<vmem>>, vector<128x8xf32>,
    return
  }
  func.func @transform_0(%arg0: i32) -> (i32, i32) {
    %c0_i32 = arith.constant 0 : i32
    %c0_i32_0 = arith.constant 0 : i32
    return %arg0, %c0_i32 : i32, i32
  }
  func.func @transform_1(%arg0: i32) -> (i32, i32) {
    %c0_i32 = arith.constant 0 : i32
    %c0_i32_0 = arith.constant 0 : i32
    %c0_i32_1 = arith.constant 0 : i32
    return %c0_i32, %c0_i32_0 : i32, i32
  }
  func.func @transform_2(%arg0: i32) -> (i32, i32) {
    %c0_i32 = arith.constant 0 : i32
    %c0_i32_0 = arith.constant 0 : i32
    %c0_i32_1 = arith.constant 0 : i32
    return %c0_i32, %c0_i32_0 : i32, i32
  }
  func.func @transform_3(%arg0: i32) -> (i32, i32) {
    %c0_i32 = arith.constant 0 : i32
    %c0_i32_0 = arith.constant 0 : i32
    return %arg0, %c0_i32 : i32, i32
  }
}

module attributes {stable_mosaic.version = 11 : i64} {
  func.func @bn_relu_matmul_stats_kernel(%arg0: i32, %arg1: memref<128x32xbf16, #tpu.memory_space<vmem>>, %arg2: memref<1x32xf32, #tpu.memory_space<vmem>>, %arg3: memref<1x32xf32, #tpu.memory_space<vmem>>, %arg4: memref<32x8xbf16, #tpu.memory_space<vmem>>, %arg5: memref<1x8xf32, #tpu.memory_space<vmem>>, %arg6: memref<128x8xbf16, #tpu.memory_space<vmem>>, %arg7: memref<8x8xf32, #tpu.memory_space<vmem>>, %arg8: memref<8x8xf32, #tpu.memory_space<vmem>>) attributes {dimension_semantics = [#tpu.dimension_semantics<parallel>], iteration_bounds = array<i64: 4>, scalar_prefetch = 0 : i64, scratch_operands = 0 : i64, tpu.core_type = #tpu.core_type<tc>, window_params = [{transform_indices = @transform_0, window_bounds = array<i64: 128, 32>}, {pipeline_mode = #tpu.pipeline_mode<synchronous>, transform_indices = @transform_1, window_bounds = array<i64: 1, 32>}, {pipeline_mode = #tpu.pipeline_mode<synchronous>, transform_indices = @transform_2, window_bounds = array<i64: 1, 32>}, {pipeline_mode = #tpu.pipeline_mode<synchronous>, transform_indices = @transform_3, window_bounds = array<i64: 32, 8>}, {pipeline_mode = #tpu.pipeline_mode<synchronous>, transform_indices = @transform_4, window_bounds = array<i64: 1, 8>}, {transform_indices = @transform_5, window_bounds = array<i64: 128, 8>}, {transform_indices = @transform_6, window_bounds = array<i64: 8, 8>}, {transform_indices = @transform_7, window_bounds = array<i64: 8, 8>}]} {
    %c0 = arith.constant 0 : index
    %c0_0 = arith.constant 0 : index
    %0 = vector.load %arg1[%c0, %c0_0] : memref<128x32xbf16, #tpu.memory_space<vmem>>, vector<128x32xbf16>
    %1 = arith.extf %0 : vector<128x32xbf16> to vector<128x32xf32>
    %c0_1 = arith.constant 0 : index
    %c0_2 = arith.constant 0 : index
    %2 = vector.load %arg2[%c0_1, %c0_2] : memref<1x32xf32, #tpu.memory_space<vmem>>, vector<1x32xf32>
    %3 = vector.broadcast %2 : vector<1x32xf32> to vector<128x32xf32>
    %4 = arith.mulf %1, %3 : vector<128x32xf32>
    %c0_3 = arith.constant 0 : index
    %c0_4 = arith.constant 0 : index
    %5 = vector.load %arg3[%c0_3, %c0_4] : memref<1x32xf32, #tpu.memory_space<vmem>>, vector<1x32xf32>
    %6 = vector.broadcast %5 : vector<1x32xf32> to vector<128x32xf32>
    %7 = arith.addf %4, %6 : vector<128x32xf32>
    %cst = arith.constant 0.000000e+00 : f32
    %8 = vector.broadcast %cst : f32 to vector<128x32xf32>
    %9 = arith.maximumf %7, %8 : vector<128x32xf32>
    %10 = arith.truncf %9 : vector<128x32xf32> to vector<128x32xbf16>
    %c0_5 = arith.constant 0 : index
    %c0_6 = arith.constant 0 : index
    %11 = vector.load %arg4[%c0_5, %c0_6] : memref<32x8xbf16, #tpu.memory_space<vmem>>, vector<32x8xbf16>
    %cst_7 = arith.constant dense<0.000000e+00> : vector<128x8xf32>
    %12 = tpu.matmul %10, %11, %cst_7 {dimension_numbers = #tpu.dot_dimension_numbers<[1], [0], [0], [1], [0, 0, 1, 1], [], []>} : vector<128x32xbf16>, vector<32x8xbf16>, vector<128x8xf32> -> vector<128x8xf32>
    %c0_8 = arith.constant 0 : index
    %c0_9 = arith.constant 0 : index
    %13 = vector.load %arg5[%c0_8, %c0_9] : memref<1x8xf32, #tpu.memory_space<vmem>>, vector<1x8xf32>
    %14 = vector.broadcast %13 : vector<1x8xf32> to vector<128x8xf32>
    %15 = arith.addf %12, %14 : vector<128x8xf32>
    %16 = arith.truncf %15 : vector<128x8xf32> to vector<128x8xbf16>
    %c0_10 = arith.constant 0 : index
    %c0_11 = arith.constant 0 : index
    %17 = vector.load %arg6[%c0_10, %c0_11] : memref<128x8xbf16, #tpu.memory_space<vmem>>, vector<128x8xbf16>
    tpu.vector_store %arg6[%c0_10, %c0_11], %16 {strides = array<i32>} : memref<128x8xbf16, #tpu.memory_space<vmem>>, vector<128x8xbf16>,
    %18 = tpu.iota {dimensions = array<i32: 0>} : vector<128x1xi32>
    %c128_i32 = arith.constant 128 : i32
    %19 = arith.muli %arg0, %c128_i32 : i32
    %20 = vector.broadcast %19 : i32 to vector<128x1xi32>
    %21 = arith.addi %18, %20 : vector<128x1xi32>
    %c512_i32 = arith.constant 512 : i32
    %22 = vector.broadcast %c512_i32 : i32 to vector<128x1xi32>
    %23 = arith.cmpi slt, %21, %22 : vector<128x1xi32>
    %24 = arith.extui %23 : vector<128x1xi1> to vector<128x1xi32>
    %25 = arith.sitofp %24 : vector<128x1xi32> to vector<128x1xf32>
    %26 = vector.broadcast %25 : vector<128x1xf32> to vector<128x8xf32>
    %27 = arith.mulf %15, %26 : vector<128x8xf32>
    %cst_12 = arith.constant dense<0.000000e+00> : vector<8xf32>
    %28 = vector.multi_reduction <add>, %27, %cst_12 [0] : vector<128x8xf32> to vector<8xf32>
    %29 = vector.shape_cast %28 : vector<8xf32> to vector<1x8xf32>
    %30 = vector.shape_cast %29 : vector<1x8xf32> to vector<1x8xf32>
    %31 = vector.broadcast %30 : vector<1x8xf32> to vector<8x8xf32>
    %c0_13 = arith.constant 0 : index
    %c0_14 = arith.constant 0 : index
    %32 = vector.load %arg7[%c0_13, %c0_14] : memref<8x8xf32, #tpu.memory_space<vmem>>, vector<8x8xf32>
    tpu.vector_store %arg7[%c0_13, %c0_14], %31 {strides = array<i32>} : memref<8x8xf32, #tpu.memory_space<vmem>>, vector<8x8xf32>,
    %33 = arith.mulf %27, %15 : vector<128x8xf32>
    %cst_15 = arith.constant dense<0.000000e+00> : vector<8xf32>
    %34 = vector.multi_reduction <add>, %33, %cst_15 [0] : vector<128x8xf32> to vector<8xf32>
    %35 = vector.shape_cast %34 : vector<8xf32> to vector<1x8xf32>
    %36 = vector.shape_cast %35 : vector<1x8xf32> to vector<1x8xf32>
    %37 = vector.broadcast %36 : vector<1x8xf32> to vector<8x8xf32>
    %c0_16 = arith.constant 0 : index
    %c0_17 = arith.constant 0 : index
    %38 = vector.load %arg8[%c0_16, %c0_17] : memref<8x8xf32, #tpu.memory_space<vmem>>, vector<8x8xf32>
    tpu.vector_store %arg8[%c0_16, %c0_17], %37 {strides = array<i32>} : memref<8x8xf32, #tpu.memory_space<vmem>>, vector<8x8xf32>,
    return
  }
  func.func @transform_0(%arg0: i32) -> (i32, i32) {
    %c0_i32 = arith.constant 0 : i32
    %c0_i32_0 = arith.constant 0 : i32
    return %arg0, %c0_i32 : i32, i32
  }
  func.func @transform_1(%arg0: i32) -> (i32, i32) {
    %c0_i32 = arith.constant 0 : i32
    %c0_i32_0 = arith.constant 0 : i32
    %c0_i32_1 = arith.constant 0 : i32
    return %c0_i32, %c0_i32_0 : i32, i32
  }
  func.func @transform_2(%arg0: i32) -> (i32, i32) {
    %c0_i32 = arith.constant 0 : i32
    %c0_i32_0 = arith.constant 0 : i32
    %c0_i32_1 = arith.constant 0 : i32
    return %c0_i32, %c0_i32_0 : i32, i32
  }
  func.func @transform_3(%arg0: i32) -> (i32, i32) {
    %c0_i32 = arith.constant 0 : i32
    %c0_i32_0 = arith.constant 0 : i32
    %c0_i32_1 = arith.constant 0 : i32
    return %c0_i32, %c0_i32_0 : i32, i32
  }
  func.func @transform_4(%arg0: i32) -> (i32, i32) {
    %c0_i32 = arith.constant 0 : i32
    %c0_i32_0 = arith.constant 0 : i32
    %c0_i32_1 = arith.constant 0 : i32
    return %c0_i32, %c0_i32_0 : i32, i32
  }
  func.func @transform_5(%arg0: i32) -> (i32, i32) {
    %c0_i32 = arith.constant 0 : i32
    %c0_i32_0 = arith.constant 0 : i32
    return %arg0, %c0_i32 : i32, i32
  }
  func.func @transform_6(%arg0: i32) -> (i32, i32) {
    %c0_i32 = arith.constant 0 : i32
    %c0_i32_0 = arith.constant 0 : i32
    return %arg0, %c0_i32 : i32, i32
  }
  func.func @transform_7(%arg0: i32) -> (i32, i32) {
    %c0_i32 = arith.constant 0 : i32
    %c0_i32_0 = arith.constant 0 : i32
    return %arg0, %c0_i32 : i32, i32
  }
}

</mosaic_0001>

<bundles_post_ra>
// kernel: dilated_conv_forward.5
= control target key start
LH: loop header
LB: loop body
LE: loop exit
PB: predicated region body
PF: predicated region fallthrough
CT: control target
= control target key end

     0   :  { %s429_s12 = smov 0   ;;  %s536_s0 = inlined_call_operand.vmem [shape: bf16[512,8], index: 0, kind: input, shape index: {}]   ;;  %s537_s1 = inlined_call_operand.vmem [shape: f32[1,8], index: 1, kind: input, shape index: {}]   ;;  %s538_s2 = inlined_call_operand.vmem [shape: f32[1,8], index: 2, kind: input, shape index: {}]   ;;  %s539_s3 = inlined_call_operand.vmem [shape: f32[512,8], index: 3, kind: output, shape index: {}]  }
   0x1 LB: > { %s341_s13 = sadd.s32 4294967295, %s407_s12   ;;  %p345_p0 = scmp.ge.s32.totalorder %s407_s12, 1  ;;  %s407_s12 = sphi %s429_s12, %s13_s12  }
   0x2   : > { %p138_p1 = scmp.lt.s32.totalorder %s407_s12, 5 }
   0x4   : > { %p139_p2 = pnand %p345_p0, %p138_p1 }
   0x5   : > { %s346_s14 = sshll.u32 (!%p139_p2), %s341_s13, 4  ;;  %v448_v0 = vld [vmem:[%s537_s1] ss:$0 sm:$0xff] (!%p139_p2)  ;;  %vm268_vm0 = vcmask (!%p139_p2), 64512  }
   0x6   : > { %142 = sbr.rel (%p139_p2) target bundleno = 37 (0x25), region = 32  ;;  %p163_p3 = scmp.lt.s32.totalorder (!%p139_p2), %s346_s14, 63  ;;  %v457_v9 = vld [vmem:[%s538_s2] ss:$0 sm:$0xff] (!%p139_p2) }
   0xd   : > { %s541_s14 = smov (!%p163_p3, %s346_s14), 63 }
   0xe   : > { %s347_s15 = sshll.u32 %s541_s14, 2  ;;  %s349_s23 = sshll.u32 %s541_s14, 3 }
   0xf   : > { %s443_s18 = scalar_lea.vmem %s536_s0, %s347_s15  ;;  %s475_s26 = scalar_lea.vmem %s539_s3, %s349_s23 }
  0x10   : > { %v355_v1 = vld [vmem:[%s443_s18] sm:$0xff]   ;;  %v386_v2 = vld [vmem:[%s443_s18 + $0x8] sm:$0xff]   ;;  %v387_v3 = vld [vmem:[%s443_s18 + $0x10] sm:$0xff]  }
  0x11   : > { %v356_v4 = vunpack.c.l.bf16 %v355_v1  ;;  %v357_v5 = vunpack.c.h.bf16 %v355_v1  ;;  %v360_v6 = vunpack.c.l.bf16 %v386_v2  ;;  %v361_v7 = vunpack.c.h.bf16 %v386_v2  ;;  %v388_v8 = vld [vmem:[%s443_s18 + $0x18] sm:$0xff]   ;;  %v389_v30 = vld [vmem:[%s443_s18 + $0x20] sm:$0xff]   ;;  %v390_v31 = vld [vmem:[%s443_s18 + $0x28] sm:$0xff]  }
  0x12   : > { %v364_v10 = vunpack.c.l.bf16 %v387_v3  ;;  %v365_v11 = vunpack.c.h.bf16 %v387_v3  ;;  %v368_v12 = vunpack.c.l.bf16 %v388_v8  ;;  %v369_v13 = vunpack.c.h.bf16 %v388_v8  ;;  %v391_v36 = vld [vmem:[%s443_s18 + $0x30] sm:$0xff]   ;;  %v392_v37 = vld [vmem:[%s443_s18 + $0x38] sm:$0xff]  }
  0x13   : > { %v213_v14 = vmul.f32 %v356_v4, %v448_v0  ;;  %v214_v15 = vmul.f32 %v357_v5, %v448_v0  ;;  %v215_v16 = vmul.f32 %v360_v6, %v448_v0  ;;  %v216_v17 = vmul.f32 %v361_v7, %v448_v0 }
  0x14   : > { %v217_v18 = vmul.f32 %v364_v10, %v448_v0  ;;  %v218_v19 = vmul.f32 %v365_v11, %v448_v0  ;;  %v219_v20 = vmul.f32 %v368_v12, %v448_v0  ;;  %v220_v21 = vmul.f32 %v369_v13, %v448_v0 }
  0x15   : > { %v236_v22 = vadd.f32 %v457_v9, %v213_v14  ;;  %v237_v23 = vadd.f32 %v457_v9, %v214_v15  ;;  %v238_v24 = vadd.f32 %v457_v9, %v215_v16  ;;  %v239_v25 = vadd.f32 %v457_v9, %v216_v17 }
  0x16   : > { %v240_v26 = vadd.f32 %v457_v9, %v217_v18  ;;  %v241_v27 = vadd.f32 %v457_v9, %v218_v19  ;;  %v242_v28 = vadd.f32 %v457_v9, %v219_v20  ;;  %v243_v29 = vadd.f32 %v457_v9, %v220_v21 }
  0x17   : > { %v252_v32 = vmax.f32 %v236_v22, 0.0  ;;  %v253_v33 = vmax.f32 %v237_v23, 0.0  ;;  %v254_v34 = vmax.f32 %v238_v24, 0.0  ;;  %v255_v35 = vmax.f32 %v239_v25, 0.0 }
  0x18   : > { %v256_v38 = vmax.f32 %v240_v26, 0.0  ;;  %v257_v39 = vmax.f32 %v241_v27, 0.0  ;;  %v258_v40 = vmax.f32 %v242_v28, 0.0  ;;  %v259_v41 = vmax.f32 %v243_v29, 0.0 }
  0x19   : > { %269 = vst.msk [vmem:[%s475_s26] sm:$0xff] %vm268_vm0, %v252_v32  ;;  %270 = vst.msk [vmem:[%s475_s26 + $0x8] sm:$0xff] %vm268_vm0, %v253_v33  ;;  %v372_v42 = vunpack.c.l.bf16 %v389_v30  ;;  %v373_v43 = vunpack.c.h.bf16 %v389_v30  ;;  %v376_v44 = vunpack.c.l.bf16 %v390_v31  ;;  %v377_v45 = vunpack.c.h.bf16 %v390_v31 }
  0x1a   : > { %271 = vst.msk [vmem:[%s475_s26 + $0x10] sm:$0xff] %vm268_vm0, %v254_v34  ;;  %272 = vst.msk [vmem:[%s475_s26 + $0x18] sm:$0xff] %vm268_vm0, %v255_v35  ;;  %v380_v46 = vunpack.c.l.bf16 %v391_v36  ;;  %v381_v47 = vunpack.c.h.bf16 %v391_v36  ;;  %v384_v48 = vunpack.c.l.bf16 %v392_v37  ;;  %v385_v49 = vunpack.c.h.bf16 %v392_v37 }
  0x1b   : > { %273 = vst.msk [vmem:[%s475_s26 + $0x20] sm:$0xff] %vm268_vm0, %v256_v38  ;;  %274 = vst.msk [vmem:[%s475_s26 + $0x28] sm:$0xff] %vm268_vm0, %v257_v39  ;;  %v221_v50 = vmul.f32 %v372_v42, %v448_v0  ;;  %v222_v51 = vmul.f32 %v373_v43, %v448_v0  ;;  %v223_v52 = vmul.f32 %v376_v44, %v448_v0 }
  0x1c   : > { %275 = vst.msk [vmem:[%s475_s26 + $0x30] sm:$0xff] %vm268_vm0, %v258_v40  ;;  %276 = vst.msk [vmem:[%s475_s26 + $0x38] sm:$0xff] %vm268_vm0, %v259_v41  ;;  %v224_v53 = vmul.f32 %v377_v45, %v448_v0  ;;  %v225_v54 = vmul.f32 %v380_v46, %v448_v0  ;;  %v226_v55 = vmul.f32 %v381_v47, %v448_v0 }
  0x1d   : > { %v227_v56 = vmul.f32 %v384_v48, %v448_v0  ;;  %v228_v57 = vmul.f32 %v385_v49, %v448_v0  ;;  %v244_v58 = vadd.f32 %v457_v9, %v221_v50  ;;  %v245_v59 = vadd.f32 %v457_v9, %v222_v51 }
  0x1e   : > { %v246_v60 = vadd.f32 %v457_v9, %v223_v52  ;;  %v247_v61 = vadd.f32 %v457_v9, %v224_v53  ;;  %v248_v62 = vadd.f32 %v457_v9, %v225_v54  ;;  %v249_v63 = vadd.f32 %v457_v9, %v226_v55 }
  0x1f   : > { %v250_v0 = vadd.f32 %v457_v9, %v227_v56  ;;  %v251_v1 = vadd.f32 %v457_v9, %v228_v57  ;;  %v260_v2 = vmax.f32 %v244_v58, 0.0  ;;  %v261_v3 = vmax.f32 %v245_v59, 0.0 }
  0x20   : > { %v262_v4 = vmax.f32 %v246_v60, 0.0  ;;  %v263_v5 = vmax.f32 %v247_v61, 0.0  ;;  %v264_v6 = vmax.f32 %v248_v62, 0.0  ;;  %v265_v7 = vmax.f32 %v249_v63, 0.0 }
  0x21   : > { %v266_v8 = vmax.f32 %v250_v0, 0.0  ;;  %v267_v10 = vmax.f32 %v251_v1, 0.0  ;;  %277 = vst.msk [vmem:[%s475_s26 + $0x40] sm:$0xff] %vm268_vm0, %v260_v2  ;;  %278 = vst.msk [vmem:[%s475_s26 + $0x48] sm:$0xff] %vm268_vm0, %v261_v3 }
  0x22   : > { %279 = vst.msk [vmem:[%s475_s26 + $0x50] sm:$0xff] %vm268_vm0, %v262_v4  ;;  %280 = vst.msk [vmem:[%s475_s26 + $0x58] sm:$0xff] %vm268_vm0, %v263_v5 }
  0x23   : > { %281 = vst.msk [vmem:[%s475_s26 + $0x60] sm:$0xff] %vm268_vm0, %v264_v6  ;;  %282 = vst.msk [vmem:[%s475_s26 + $0x68] sm:$0xff] %vm268_vm0, %v265_v7 }
  0x24   : > { %283 = vst.msk [vmem:[%s475_s26 + $0x70] sm:$0xff] %vm268_vm0, %v266_v8  ;;  %284 = vst.msk [vmem:[%s475_s26 + $0x78] sm:$0xff] %vm268_vm0, %v267_v10 }
  0x25 PF: > { %s13_s12 = sadd.s32 1, %s407_s12  }
  0x26   : > { %p10_p4 = scmp.ge.s32.totalorder %s13_s12, 6  }
  0x28   :  { %12 = sbr.rel (!%p10_p4) target bundleno = 1 (0x1), region = 62 }

// kernel: dilated_conv_forward.3
= control target key start
LH: loop header
LB: loop body
LE: loop exit
PB: predicated region body
PF: predicated region fallthrough
CT: control target
= control target key end

     0   :  { %s1132_s18 = smov 0   ;;  %s1426_s0 = inlined_call_operand.vmem [shape: bf16[512,144], index: 0, kind: input, shape index: {}]   ;;  %s1427_s1 = inlined_call_operand.vmem [shape: bf16[144,32], index: 1, kind: input, shape index: {}]   ;;  %s1428_s2 = inlined_call_operand.vmem [shape: f32[1,32], index: 2, kind: input, shape index: {}]   ;;  %s1429_s3 = inlined_call_operand.vmem [shape: bf16[512,32], index: 3, kind: output, shape index: {0}]   ;;  %s1430_s4 = inlined_call_operand.vmem [shape: f32[32,32], index: 4, kind: output, shape index: {1}]   ;;  %s1431_s5 = inlined_call_operand.vmem [shape: f32[32,32], index: 5, kind: output, shape index: {2}]  }
   0x1 LB: > { %s1138_s19 = sadd.s32 4294967295, %s1098_s18   ;;  %p937_p0 = scmp.ge.s32.totalorder %s1098_s18, 1  ;;  %s1098_s18 = sphi %s1132_s18, %s16_s18  }
   0x2   : > { %p194_p1 = scmp.lt.s32.totalorder %s1098_s18, 5 }
   0x4   : > { %p195_p2 = pnand %p937_p0, %p194_p1 }
   0x5   : > { %v1059_v0 = vld [vmem:[%s1427_s1] sm:$0xff] (!%p195_p2)   ;;  %v1100_v1 = vmov (!%p195_p2), 0   ;;  %s938_s22 = sshll.u32 (!%p195_p2), %s1138_s19, 4  ;;  %v1060_v2 = vld [vmem:[%s1427_s1 + $0x8] sm:$0xff] (!%p195_p2)   ;;  %v1061_v3 = vld [vmem:[%s1427_s1 + $0x10] sm:$0xff] (!%p195_p2)   ;;  %vm420_vm0 = vcmask (!%p195_p2), 130048   ;;  %v623_v26 = vlaneseq (!%p195_p2) }
   0x6   : > { %198 = sbr.rel (%p195_p2) target bundleno = 318 (0x13e), region = 32  ;;  %445 = vmatprep.subr.bf16.mxu0 (!%p195_p2), %v1100_v1  ;;  %1031 = vmatprep.subr.bf16.mxu1 (!%p195_p2), %v1100_v1  ;;  %p232_p3 = scmp.lt.s32.totalorder (!%p195_p2), %s938_s22, 63  ;;  %v1062_v4 = vld [vmem:[%s1427_s1 + $0x18] sm:$0xff] (!%p195_p2)   ;;  %v1063_v7 = vld [vmem:[%s1427_s1 + $0x20] sm:$0xff] (!%p195_p2)   ;;  %v1064_v8 = vld [vmem:[%s1427_s1 + $0x28] sm:$0xff] (!%p195_p2)   ;;  %v1101_v40 = vmov (!%p195_p2), 0.0  }
   0x7   : > { %446 = vmatpush1.bf16.msra.mxu0 (!%p195_p2), %v1059_v0  ;;  %1040 = vmatpush1.bf16.msra.mxu1 (!%p195_p2), %v1059_v0  ;;  %v1065_v9 = vld [vmem:[%s1427_s1 + $0x30] sm:$0xff] (!%p195_p2)   ;;  %v1066_v10 = vld [vmem:[%s1427_s1 + $0x38] sm:$0xff] (!%p195_p2)   ;;  %v1067_v11 = vld [vmem:[%s1427_s1 + $0x40] sm:$0xff] (!%p195_p2)   ;;  %v1202_v27 = vshrl.u32 (!%p195_p2), %v623_v26, 7  ;;  %s995_s20 = sshll.u32 (!%p195_p2), %s1138_s19, 7  ;;  %vm606_vm4 = vcmask (!%p195_p2), 257024  }
   0x8   : > { %447 = vmatprep.subr.bf16.mxu0 (!%p195_p2), %v1100_v1  ;;  %1032 = vmatprep.subr.bf16.mxu1 (!%p195_p2), %v1100_v1  ;;  %v1205_v28 = vstv (!%p195_p2), %s995_s20  ;;  %v1218_v36 = vld [vmem:[%s1428_s2] ss:$0 sm:$0xff] (!%p195_p2)  ;;  %vm722_vm6 = vcmask (!%p195_p2), 261120   ;;  %p244_p4 = scmp.lt.s32.totalorder (!%p195_p2), %s1138_s19, 3 }
   0x9   : > { %v625_v29 = vadd.s32 (!%p195_p2), 8, %v1202_v27  ;;  %v642_v30 = vadd.s32 (!%p195_p2), %v1205_v28, %v1202_v27  ;;  %v626_v31 = vadd.s32 (!%p195_p2), 16, %v1202_v27  ;;  %v627_v32 = vadd.s32 (!%p195_p2), 24, %v1202_v27 }
   0xa   : > { %v632_v35 = vadd.s32 (!%p195_p2), 64, %v1202_v27  ;;  %v633_v38 = vadd.s32 (!%p195_p2), 72, %v1202_v27  ;;  %v628_v43 = vadd.s32 (!%p195_p2), 32, %v1202_v27 }
   0xb   : > { %448 = vmatpush1.bf16.msra.mxu0 (!%p195_p2), %v1060_v2  ;;  %1041 = vmatpush1.bf16.msra.mxu1 (!%p195_p2), %v1060_v2  ;;  %v643_v33 = vadd.s32 (!%p195_p2), %v1205_v28, %v625_v29  ;;  %vm658_vm1 = vcmp.lt.s32.totalorder (!%p195_p2), %v642_v30, 512  ;;  %v644_v34 = vadd.s32 (!%p195_p2), %v1205_v28, %v626_v31  ;;  %v645_v37 = vadd.s32 (!%p195_p2), %v1205_v28, %v627_v32 }
   0xc   : > { %449 = vmatprep.subr.bf16.mxu0 (!%p195_p2), %v1100_v1  ;;  %1033 = vmatprep.subr.bf16.mxu1 (!%p195_p2), %v1100_v1  ;;  %v996_v41 = vsel (!%p195_p2), %vm658_vm1, 1.0, %v1101_v40  ;;  %v650_v47 = vadd.s32 (!%p195_p2), %v1205_v28, %v632_v35  ;;  %v651_v52 = vadd.s32 (!%p195_p2), %v1205_v28, %v633_v38  ;;  %v646_v61 = vadd.s32 (!%p195_p2), %v1205_v28, %v628_v43 }
   0xd   : > { %s1433_s22 = smov (!%p232_p3, %s938_s22), 63  ;;  %vm659_vm2 = vcmp.lt.s32.totalorder %v643_v33, 512  ;;  %vm660_vm3 = vcmp.lt.s32.totalorder %v644_v34, 512  ;;  %vm661_vm5 = vcmp.lt.s32.totalorder %v645_v37, 512  ;;  %v630_v37 = vadd.s32 48, %v1202_v27  ;;  %s1435_s19 = smov (!%p244_p4, %s1138_s19), 3 }
   0xe   : > { %s1014_s27 = sshll.u32 %s1433_s22, 3  ;;  %s942_s24 = sshll.u32 %s1433_s22, 2  ;;  %v997_v50 = vsel %vm659_vm2, 1.0, %v1101_v40  ;;  %v998_v59 = vsel %vm660_vm3, 1.0, %v1101_v40  ;;  %vm666_vm7 = vcmp.lt.s32.totalorder %v650_v47, 512  ;;  %vm667_vm8 = vcmp.lt.s32.totalorder %v651_v52, 512 }
   0xf   : > { %s1158_s30 = scalar_lea.vmem %s1426_s0, %s1014_s27  ;;  %450 = vmatpush1.bf16.msra.mxu0 %v1061_v3  ;;  %1042 = vmatpush1.bf16.msra.mxu1 %v1061_v3  ;;  %s1233_s26 = scalar_lea.vmem %s1429_s3, %s942_s24  ;;  %v629_v3 = vadd.s32 40, %v1202_v27  ;;  %vm662_vm9 = vcmp.lt.s32.totalorder %v646_v61, 512 }
  0x10   : > { %v1070_v5 = vld [vmem:[%s1158_s30 + $0x4] ss:$8 sps:$4 sm:$0xff]   ;;  %451 = vmatprep.subr.bf16.mxu0 %v1100_v1  ;;  %1034 = vmatprep.subr.bf16.mxu1 %v1100_v1  ;;  %v1068_v12 = vld [vmem:[%s1158_s30] ss:$8 sps:$4 sm:$0xff]   ;;  %v1071_v14 = vld [vmem:[%s1158_s30 + $0x14] ss:$8 sps:$4 sm:$0xff]  }
  0x11   : > { %971 = vmatprep.mubr.msk.bf16.mxu0 %vm420_vm0, %v1070_v5  ;;  %v1076_v6 = vld [vmem:[%s1158_s30 + $0x44] ss:$8 sps:$4 sm:$0xff]   ;;  %v1074_v13 = vld [vmem:[%s1158_s30 + $0x40] ss:$8 sps:$4 sm:$0xff]   ;;  %v1080_v15 = vld [vmem:[%s1158_s30 + $0x54] ss:$8 sps:$4 sm:$0xff]  }
  0x12   : > { %975 = vmatprep.mubr.msk.bf16.mxu1 %vm420_vm0, %v1076_v6  ;;  %v1073_v16 = vld [vmem:[%s1158_s30 + $0x10] ss:$8 sps:$4 sm:$0xff]   ;;  %v1077_v18 = vld [vmem:[%s1158_s30 + $0x24] ss:$8 sps:$4 sm:$0xff]   ;;  %v1079_v20 = vld [vmem:[%s1158_s30 + $0x20] ss:$8 sps:$4 sm:$0xff]  }
  0x13   : > { %452 = vmatpush1.bf16.msra.mxu0 %v1062_v4  ;;  %1043 = vmatpush1.bf16.msra.mxu1 %v1062_v4  ;;  %v1082_v17 = vld [vmem:[%s1158_s30 + $0x50] ss:$8 sps:$4 sm:$0xff]   ;;  %v1086_v19 = vld [vmem:[%s1158_s30 + $0x64] ss:$8 sps:$4 sm:$0xff]   ;;  %v1088_v21 = vld [vmem:[%s1158_s30 + $0x60] ss:$8 sps:$4 sm:$0xff]  }
  0x14   : > { %453 = vmatprep.subr.bf16.mxu0 %v1100_v1  ;;  %1035 = vmatprep.subr.bf16.mxu1 %v1100_v1  ;;  %v1083_v22 = vld [vmem:[%s1158_s30 + $0x34] ss:$8 sps:$4 sm:$0xff]   ;;  %v1085_v24 = vld [vmem:[%s1158_s30 + $0x30] ss:$8 sps:$4 sm:$0xff]   ;;  %v634_v4 = vadd.s32 80, %v1202_v27  ;;  %v1000_v33 = vsel %vm662_vm9, 1.0, %v1101_v40 }
  0x15   : > { %v1089_v23 = vld [vmem:[%s1158_s30 + $0x74] ss:$8 sps:$4 sm:$0xff]   ;;  %v1091_v25 = vld [vmem:[%s1158_s30 + $0x70] ss:$8 sps:$4 sm:$0xff]   ;;  %s943_s27 = sshll.u32 %s1435_s19, 3 }
  0x16   : > { %s247_s30 = scalar_lea.vmem %s1430_s4, %s943_s27  ;;  %s251_s8 = scalar_lea.vmem %s1431_s5, %s943_s27 }
  0x17   : > { %454 = vmatpush1.bf16.msra.mxu0 %v1063_v7  ;;  %1044 = vmatpush1.bf16.msra.mxu1 %v1063_v7 }
  0x18   : > { %455 = vmatprep.subr.bf16.mxu0 %v1100_v1  ;;  %1036 = vmatprep.subr.bf16.mxu1 %v1100_v1 }
  0x1b   : > { %456 = vmatpush1.bf16.msra.mxu0 %v1064_v8  ;;  %1045 = vmatpush1.bf16.msra.mxu1 %v1064_v8 }
  0x1c   : > { %457 = vmatprep.subr.bf16.mxu0 %v1100_v1  ;;  %1037 = vmatprep.subr.bf16.mxu1 %v1100_v1 }
  0x1f   : > { %458 = vmatpush1.bf16.msra.mxu0 %v1065_v9  ;;  %1046 = vmatpush1.bf16.msra.mxu1 %v1065_v9 }
  0x20   : > { %459 = vmatprep.subr.bf16.mxu0 %v1100_v1  ;;  %1038 = vmatprep.subr.bf16.mxu1 %v1100_v1 }
  0x23   : > { %460 = vmatpush1.bf16.msra.mxu0 %v1066_v10  ;;  %1047 = vmatpush1.bf16.msra.mxu1 %v1066_v10  ;;  %v1261_v10 = vsel %vm666_vm7, 1.0, %v1101_v40 }
  0x24   : > { %461 = vmatprep.subr.bf16.mxu0 %v1100_v1  ;;  %1039 = vmatprep.subr.bf16.mxu1 %v1100_v1  ;;  %v999_v1 = vsel %vm661_vm5, 1.0, %v1101_v40 }
  0x27   : > { %462 = vmatpush1.bf16.msra.mxu0 %v1067_v11  ;;  %1048 = vmatpush1.bf16.msra.mxu1 %v1067_v11 }
  0x2a   : > { %478 = vmatmul.mubr.bf16.vlgmr.msra.gmra.mrb[0].mxu0 %v1068_v12  ;;  %510 = vmatmul.mubr.bf16.vlgmr.msra.gmra.mrb[0].mxu1 %v1074_v13  ;;  %v635_v12 = vadd.s32 88, %v1202_v27 }
  0x2b   : > { %972 = vmatprep.mubr.msk.bf16.mxu0 %vm420_vm0, %v1071_v14  ;;  %976 = vmatprep.mubr.msk.bf16.mxu1 %vm420_vm0, %v1080_v15 }
  0x2c   : > { %v653_v35 = vadd.s32 %v1205_v28, %v635_v12 }
  0x2e   : > { %vm669_vm12 = vcmp.lt.s32.totalorder %v653_v35, 512  ;;  %v638_v35 = vadd.s32 112, %v1202_v27 }
  0x32   : > { %486 = vmatmul.mubr.bf16.gmra.mrb[4].mxu0 %v1073_v16  ;;  %518 = vmatmul.mubr.bf16.gmra.mrb[4].mxu1 %v1082_v17 }
  0x33   : > { %973 = vmatprep.mubr.msk.bf16.mxu0 %vm420_vm0, %v1077_v18  ;;  %977 = vmatprep.mubr.msk.bf16.mxu1 %vm420_vm0, %v1086_v19 }
  0x3a   : > { %494 = vmatmul.mubr.bf16.gmra.mrb[8].mxu0 %v1079_v20  ;;  %526 = vmatmul.mubr.bf16.gmra.mrb[8].mxu1 %v1088_v21  ;;  %v1274_v21 = vsel %vm667_vm8, 1.0, %v1101_v40 }
  0x3b   : > { %974 = vmatprep.mubr.msk.bf16.mxu0 %vm420_vm0, %v1083_v22  ;;  %978 = vmatprep.mubr.msk.bf16.mxu1 %vm420_vm0, %v1089_v23  ;;  %v647_v22 = vadd.s32 %v1205_v28, %v629_v3  ;;  %v652_v23 = vadd.s32 %v1205_v28, %v634_v4 }
  0x3d   : > { %vm663_vm10 = vcmp.lt.s32.totalorder %v647_v22, 512  ;;  %vm668_vm11 = vcmp.lt.s32.totalorder %v652_v23, 512 }
  0x42   : > { %502 = vmatmul.mubr.bf16.gmra.mrb[12].mxu0 %v1085_v24  ;;  %534 = vmatmul.mubr.bf16.gmra.mrb[12].mxu1 %v1091_v25 }
  0xfd   : > { %v479_v39 = vpop.f32.mrb[0].mxu0  ;;  %v511_v42 = vpop.f32.mrb[0].mxu1 }
  0xfe   : > { %v480_v44 = vadd.f32 %v1218_v36, %v479_v39  ;;  %v481_v45 = vpop.f32.mrb[1].mxu0  ;;  %v1227_v46 = vadd.f32 %v1218_v36, %v511_v42  ;;  %v513_v48 = vpop.f32.mrb[1].mxu1 }
  0xff   : > { %v482_v49 = vpop.f32.mrb[2].mxu0  ;;  %v514_v51 = vpop.f32.mrb[2].mxu1  ;;  %v631_v45 = vadd.s32 56, %v1202_v27 }
 0x100   : > { %v1015_v53 = vpack.c.bf16 %v480_v44, %v480_v44  ;;  %v706_v54 = vmul.f32 %v996_v41, %v480_v44  ;;  %v483_v55 = vadd.f32 %v1218_v36, %v482_v49  ;;  %v484_v56 = vpop.f32.mrb[3].mxu0  ;;  %v1023_v57 = vpack.c.bf16 %v1227_v46, %v1227_v46  ;;  %v516_v58 = vpop.f32.mrb[3].mxu1 }
 0x101   : > { %v1243_v60 = vadd.f32 %v1218_v36, %v514_v51 }
 0x102   : > { %607 = vst.msk [vmem:[%s1233_s26] sm:$0xf] %vm606_vm4, %v1015_v53  ;;  %v761_v62 = vmul.f32 %v706_v54, %v480_v44  ;;  %v1016_v63 = vpack.c.bf16 %v483_v55, %v483_v55  ;;  %v707_v0 = vmul.f32 %v997_v50, %v483_v55  ;;  %615 = vst.msk [vmem:[%s1233_s26 + $0x20] sm:$0xf] %vm606_vm4, %v1023_v57  ;;  %v723_v5 = vsel %vm722_vm6, %v706_v54, 0.0 }
 0x103   : > { %v1024_v2 = vpack.c.bf16 %v1243_v60, %v1243_v60  ;;  %v648_v53 = vadd.s32 %v1205_v28, %v630_v37 }
 0x104   : > { %608 = vst.msk [vmem:[%s1233_s26 + $0x4] sm:$0xf] %vm606_vm4, %v1016_v63  ;;  %v724_v6 = vsel %vm722_vm6, %v707_v0, 0.0  ;;  %v762_v7 = vmul.f32 %v707_v0, %v483_v55  ;;  %v777_v13 = vsel %vm722_vm6, %v761_v62, 0.0  ;;  %v636_v55 = vadd.s32 96, %v1202_v27 }
 0x105   : > { %v725_v8 = vadd.f32 %v724_v6, %v723_v5  ;;  %v487_v9 = vpop.f32.mrb[4].mxu0  ;;  %616 = vst.msk [vmem:[%s1233_s26 + $0x24] sm:$0xf] %vm606_vm4, %v1024_v2  ;;  %v519_v11 = vpop.f32.mrb[4].mxu1  ;;  %v1310_v0 = vsel %vm668_vm11, 1.0, %v1101_v40  ;;  %vm664_vm13 = vcmp.lt.s32.totalorder %v648_v53, 512 }
 0x106   : > { %v778_v14 = vsel %vm722_vm6, %v762_v7, 0.0  ;;  %v488_v15 = vadd.f32 %v1218_v36, %v487_v9  ;;  %v489_v16 = vpop.f32.mrb[5].mxu0  ;;  %v1270_v17 = vadd.f32 %v1218_v36, %v519_v11  ;;  %v521_v18 = vpop.f32.mrb[5].mxu1  ;;  %v1321_v12 = vadd.s32 %v1205_v28, %v636_v55 }
 0x107   : > { %v779_v19 = vadd.f32 %v778_v14, %v777_v13  ;;  %v490_v20 = vpop.f32.mrb[6].mxu0  ;;  %v522_v24 = vpop.f32.mrb[6].mxu1 }
 0x108   : > { %v1017_v25 = vpack.c.bf16 %v488_v15, %v488_v15  ;;  %v708_v26 = vmul.f32 %v998_v59, %v488_v15  ;;  %v491_v29 = vadd.f32 %v1218_v36, %v490_v20  ;;  %v492_v30 = vpop.f32.mrb[7].mxu0  ;;  %v1025_v31 = vpack.c.bf16 %v1270_v17, %v1270_v17  ;;  %v524_v32 = vpop.f32.mrb[7].mxu1 }
 0x109   : > { %v1284_v34 = vadd.f32 %v1218_v36, %v522_v24  ;;  %v1001_v59 = vsel %vm663_vm10, 1.0, %v1101_v40  ;;  %v1007_v20 = vsel %vm669_vm12, 1.0, %v1101_v40  ;;  %v1002_v32 = vsel %vm664_vm13, 1.0, %v1101_v40 }
 0x10a   : > { %609 = vst.msk [vmem:[%s1233_s26 + $0x8] sm:$0xf] %vm606_vm4, %v1017_v25  ;;  %v726_v38 = vsel %vm722_vm6, %v708_v26, 0.0  ;;  %v763_v39 = vmul.f32 %v708_v26, %v488_v15  ;;  %v1018_v41 = vpack.c.bf16 %v491_v29, %v491_v29  ;;  %v709_v42 = vmul.f32 %v999_v1, %v491_v29  ;;  %617 = vst.msk [vmem:[%s1233_s26 + $0x28] sm:$0xf] %vm606_vm4, %v1025_v31 }
 0x10b   : > { %v727_v43 = vadd.f32 %v726_v38, %v725_v8  ;;  %v1026_v44 = vpack.c.bf16 %v1284_v34, %v1284_v34  ;;  %v649_v1 = vadd.s32 %v1205_v28, %v631_v45  ;;  %v637_v8 = vadd.s32 104, %v1202_v27 }
 0x10c   : > { %v780_v47 = vsel %vm722_vm6, %v763_v39, 0.0  ;;  %610 = vst.msk [vmem:[%s1233_s26 + $0xc] sm:$0xf] %vm606_vm4, %v1018_v41  ;;  %v728_v48 = vsel %vm722_vm6, %v709_v42, 0.0  ;;  %v764_v49 = vmul.f32 %v709_v42, %v491_v29  ;;  %vm670_vm15 = vcmp.lt.s32.totalorder %v1321_v12, 512 }
 0x10d   : > { %v781_v50 = vadd.f32 %v780_v47, %v779_v19  ;;  %v729_v51 = vadd.f32 %v728_v48, %v727_v43  ;;  %v495_v52 = vpop.f32.mrb[8].mxu0  ;;  %618 = vst.msk [vmem:[%s1233_s26 + $0x2c] sm:$0xf] %vm606_vm4, %v1026_v44  ;;  %v527_v54 = vpop.f32.mrb[8].mxu1  ;;  %vm665_vm14 = vcmp.lt.s32.totalorder %v649_v1, 512  ;;  %v655_v26 = vadd.s32 %v1205_v28, %v637_v8 }
 0x10e   : > { %v782_v56 = vsel %vm722_vm6, %v764_v49, 0.0  ;;  %v496_v57 = vadd.f32 %v1218_v36, %v495_v52  ;;  %v497_v58 = vpop.f32.mrb[9].mxu0  ;;  %v529_v61 = vpop.f32.mrb[9].mxu1  ;;  %v1314_v2 = vadd.f32 %v1218_v36, %v527_v54  ;;  %v1003_v41 = vsel %vm665_vm14, 1.0, %v1101_v40 }
 0x10f   : > { %v783_v62 = vadd.f32 %v782_v56, %v781_v50  ;;  %v498_v63 = vpop.f32.mrb[10].mxu0  ;;  %v530_v3 = vpop.f32.mrb[10].mxu1  ;;  %v714_v43 = vmul.f32 %v1261_v10, %v1227_v46  ;;  %v639_v49 = vadd.s32 120, %v1202_v27  ;;  %vm671_vm0 = vcmp.lt.s32.totalorder %v655_v26, 512 }
 0x110   : > { %v1019_v4 = vpack.c.bf16 %v496_v57, %v496_v57  ;;  %v710_v5 = vmul.f32 %v1000_v33, %v496_v57  ;;  %v499_v6 = vadd.f32 %v1218_v36, %v498_v63  ;;  %v500_v7 = vpop.f32.mrb[11].mxu0  ;;  %v532_v9 = vpop.f32.mrb[11].mxu1  ;;  %v1027_v11 = vpack.c.bf16 %v1314_v2, %v1314_v2 }
 0x111   : > { %v1324_v13 = vadd.f32 %v1218_v36, %v530_v3  ;;  %v715_v10 = vmul.f32 %v1274_v21, %v1243_v60  ;;  %v656_v56 = vadd.s32 %v1205_v28, %v638_v35  ;;  %v657_v1 = vadd.s32 %v1205_v28, %v639_v49 }
 0x112   : > { %611 = vst.msk [vmem:[%s1233_s26 + $0x10] sm:$0xf] %vm606_vm4, %v1019_v4  ;;  %v730_v14 = vsel %vm722_vm6, %v710_v5, 0.0  ;;  %v765_v15 = vmul.f32 %v710_v5, %v496_v57  ;;  %v1020_v16 = vpack.c.bf16 %v499_v6, %v499_v6  ;;  %v711_v18 = vmul.f32 %v1001_v59, %v499_v6  ;;  %619 = vst.msk [vmem:[%s1233_s26 + $0x30] sm:$0xf] %vm606_vm4, %v1027_v11 }
 0x113   : > { %v731_v19 = vadd.f32 %v730_v14, %v729_v51  ;;  %v1028_v22 = vpack.c.bf16 %v1324_v13, %v1324_v13  ;;  %v716_v3 = vmul.f32 %v1310_v0, %v1270_v17  ;;  %vm672_vm1 = vcmp.lt.s32.totalorder %v656_v56, 512 }
 0x114   : > { %v784_v23 = vsel %vm722_vm6, %v765_v15, 0.0  ;;  %612 = vst.msk [vmem:[%s1233_s26 + $0x14] sm:$0xf] %vm606_vm4, %v1020_v16  ;;  %v732_v24 = vsel %vm722_vm6, %v711_v18, 0.0  ;;  %v766_v25 = vmul.f32 %v711_v18, %v499_v6  ;;  %v738_v28 = vsel %vm722_vm6, %v714_v43, 0.0 }
 0x115   : > { %v785_v29 = vadd.f32 %v784_v23, %v783_v62  ;;  %v733_v30 = vadd.f32 %v732_v24, %v731_v19  ;;  %v503_v31 = vpop.f32.mrb[12].mxu0  ;;  %620 = vst.msk [vmem:[%s1233_s26 + $0x34] sm:$0xf] %vm606_vm4, %v1028_v22  ;;  %v535_v33 = vpop.f32.mrb[12].mxu1  ;;  %v769_v62 = vmul.f32 %v714_v43, %v1227_v46  ;;  %v1008_v46 = vsel %vm670_vm15, 1.0, %v1101_v40 }
 0x116   : > { %v786_v37 = vsel %vm722_vm6, %v766_v25, 0.0  ;;  %v504_v38 = vadd.f32 %v1218_v36, %v503_v31  ;;  %v505_v39 = vpop.f32.mrb[13].mxu0  ;;  %v537_v42 = vpop.f32.mrb[13].mxu1  ;;  %v1353_v47 = vadd.f32 %v1218_v36, %v535_v33  ;;  %v770_v0 = vmul.f32 %v715_v10, %v1243_v60 }
 0x117   : > { %v787_v44 = vadd.f32 %v786_v37, %v785_v29  ;;  %v506_v45 = vpop.f32.mrb[14].mxu0  ;;  %v538_v48 = vpop.f32.mrb[14].mxu1  ;;  %v717_v8 = vmul.f32 %v1007_v20, %v1284_v34  ;;  %v1009_v15 = vsel %vm671_vm0, 1.0, %v1101_v40  ;;  %vm673_vm2 = vcmp.lt.s32.totalorder %v657_v1, 512 }
 0x118   : > { %v1021_v50 = vpack.c.bf16 %v504_v38, %v504_v38  ;;  %v712_v51 = vmul.f32 %v1002_v32, %v504_v38  ;;  %v507_v52 = vadd.f32 %v1218_v36, %v506_v45  ;;  %v508_v53 = vpop.f32.mrb[15].mxu0  ;;  %v540_v54 = vpop.f32.mrb[15].mxu1  ;;  %v1029_v55 = vpack.c.bf16 %v1353_v47, %v1353_v47 }
 0x119   : > { %v539_v57 = vadd.f32 %v1218_v36, %v538_v48  ;;  %v792_v12 = vsel %vm722_vm6, %v769_v62, 0.0  ;;  %v740_v16 = vsel %vm722_vm6, %v715_v10, 0.0  ;;  %v771_v18 = vmul.f32 %v716_v3, %v1270_v17 }
 0x11a   : > { %613 = vst.msk [vmem:[%s1233_s26 + $0x18] sm:$0xf] %vm606_vm4, %v1021_v50  ;;  %v734_v27 = vsel %vm722_vm6, %v712_v51, 0.0  ;;  %v767_v58 = vmul.f32 %v712_v51, %v504_v38  ;;  %v1022_v59 = vpack.c.bf16 %v507_v52, %v507_v52  ;;  %v713_v61 = vmul.f32 %v1003_v41, %v507_v52  ;;  %621 = vst.msk [vmem:[%s1233_s26 + $0x38] sm:$0xf] %vm606_vm4, %v1029_v55 }
 0x11b   : > { %v735_v63 = vadd.f32 %v734_v27, %v733_v30  ;;  %v1030_v21 = vpack.c.bf16 %v539_v57, %v539_v57  ;;  %v718_v19 = vmul.f32 %v1008_v46, %v1314_v2  ;;  %v1010_v20 = vsel %vm672_vm1, 1.0, %v1101_v40 }
 0x11c   : > { %v788_v36 = vsel %vm722_vm6, %v767_v58, 0.0  ;;  %614 = vst.msk [vmem:[%s1233_s26 + $0x1c] sm:$0xf] %vm606_vm4, %v1022_v59  ;;  %v736_v4 = vsel %vm722_vm6, %v713_v61, 0.0  ;;  %v768_v5 = vmul.f32 %v713_v61, %v507_v52  ;;  %v794_v23 = vsel %vm722_vm6, %v770_v0, 0.0 }
 0x11d   : > { %v789_v6 = vadd.f32 %v788_v36, %v787_v44  ;;  %v737_v7 = vadd.f32 %v736_v4, %v735_v63  ;;  %622 = vst.msk [vmem:[%s1233_s26 + $0x3c] sm:$0xf] %vm606_vm4, %v1030_v21  ;;  %v742_v24 = vsel %vm722_vm6, %v716_v3, 0.0  ;;  %v772_v25 = vmul.f32 %v717_v8, %v1284_v34 }
 0x11e   : > { %v790_v9 = vsel %vm722_vm6, %v768_v5, 0.0  ;;  %v719_v26 = vmul.f32 %v1009_v15, %v1324_v13  ;;  %v1011_v31 = vsel %vm673_vm2, 1.0, %v1101_v40  ;;  %v796_v17 = vsel %vm722_vm6, %v771_v18, 0.0 }
 0x11f   : > { %v739_v11 = vadd.f32 %v738_v28, %v737_v7  ;;  %v791_v14 = vadd.f32 %v790_v9, %v789_v6  ;;  %v744_v32 = vsel %vm722_vm6, %v717_v8, 0.0  ;;  %v773_v33 = vmul.f32 %v718_v19, %v1314_v2 }
 0x120   : > { %v720_v35 = vmul.f32 %v1010_v20, %v1353_v47  ;;  %v798_v39 = vsel %vm722_vm6, %v772_v25, 0.0  ;;  %v746_v34 = vsel %vm722_vm6, %v718_v19, 0.0  ;;  %v774_v41 = vmul.f32 %v719_v26, %v1324_v13 }
 0x121   : > { %v741_v22 = vadd.f32 %v740_v16, %v739_v11  ;;  %v793_v60 = vadd.f32 %v792_v12, %v791_v14  ;;  %v721_v42 = vmul.f32 %v1011_v31, %v539_v57  ;;  %v800_v44 = vsel %vm722_vm6, %v773_v33, 0.0 }
 0x122   : > { %v748_v45 = vsel %vm722_vm6, %v719_v26, 0.0  ;;  %v750_v2 = vsel %vm722_vm6, %v720_v35, 0.0  ;;  %v775_v48 = vmul.f32 %v720_v35, %v1353_v47  ;;  %v802_v51 = vsel %vm722_vm6, %v774_v41, 0.0 }
 0x123   : > { %v795_v29 = vadd.f32 %v794_v23, %v793_v60  ;;  %v743_v30 = vadd.f32 %v742_v24, %v741_v22  ;;  %v776_v52 = vmul.f32 %v721_v42, %v539_v57  ;;  %v752_v10 = vsel %vm722_vm6, %v721_v42, 0.0 }
 0x124   : > { %v804_v54 = vsel %vm722_vm6, %v775_v48, 0.0 }
 0x125   : > { %v745_v37 = vadd.f32 %v744_v32, %v743_v30  ;;  %v797_v38 = vadd.f32 %v796_v17, %v795_v29  ;;  %v806_v27 = vsel %vm722_vm6, %v776_v52, 0.0 }
 0x127   : > { %v747_v43 = vadd.f32 %v746_v34, %v745_v37  ;;  %v799_v40 = vadd.f32 %v798_v39, %v797_v38 }
 0x129   : > { %v801_v49 = vadd.f32 %v800_v44, %v799_v40  ;;  %v749_v50 = vadd.f32 %v748_v45, %v747_v43 }
 0x12b   : > { %v803_v53 = vadd.f32 %v802_v51, %v801_v49  ;;  %v751_v13 = vadd.f32 %v750_v2, %v749_v50 }
 0x12d   : > { %v805_v55 = vadd.f32 %v804_v54, %v803_v53  ;;  %v753_v56 = vadd.f32 %v752_v10, %v751_v13 }
 0x12f   : > { %v754_v58 = vrot.slane %v753_v56, 4  ;;  %v807_v59 = vadd.f32 %v806_v27, %v805_v55 }
 0x131   : > { %v755_v47 = vadd.f32 %v754_v58, %v753_v56  ;;  %v808_v61 = vrot.slane %v807_v59, 4 }
 0x133   : > { %v756_v62 = vrot.slane %v755_v47, 2  ;;  %v809_v63 = vadd.f32 %v808_v61, %v807_v59 }
 0x135   : > { %v757_v57 = vadd.f32 %v756_v62, %v755_v47  ;;  %v810_v21 = vrot.slane %v809_v63, 2 }
 0x137   : > { %v758_v1 = vrot.slane %v757_v57, 1  ;;  %v811_v3 = vadd.f32 %v810_v21, %v809_v63 }
 0x139   : > { %v759_v36 = vadd.f32 %v758_v1, %v757_v57  ;;  %v812_v4 = vrot.slane %v811_v3, 1 }
 0x13b   : > { %760 = vst.msk [vmem:[%s247_s30] sm:$0xff] %vm722_vm6, %v759_v36  ;;  %v813_v5 = vadd.f32 %v812_v4, %v811_v3 }
 0x13d   : > { %814 = vst.msk [vmem:[%s251_s8] sm:$0xff] %vm722_vm6, %v813_v5 }
 0x13e PF: > { %s16_s18 = sadd.s32 1, %s1098_s18  }
 0x13f   : > { %p13_p5 = scmp.ge.s32.totalorder %s16_s18, 6  }
 0x141   :  { %15 = sbr.rel (!%p13_p5) target bundleno = 1 (0x1), region = 86 }

// kernel: dilated_conv_forward.4
= control target key start
LH: loop header
LB: loop body
LE: loop exit
PB: predicated region body
PF: predicated region fallthrough
CT: control target
= control target key end

     0   :  { %s1150_s24 = smov 0   ;;  %s1423_s0 = inlined_call_operand.vmem [shape: bf16[512,32], index: 0, kind: input, shape index: {}]   ;;  %s1424_s1 = inlined_call_operand.vmem [shape: f32[1,32], index: 1, kind: input, shape index: {}]   ;;  %s1425_s2 = inlined_call_operand.vmem [shape: f32[1,32], index: 2, kind: input, shape index: {}]   ;;  %s1426_s3 = inlined_call_operand.vmem [shape: bf16[32,8], index: 3, kind: input, shape index: {}]   ;;  %s1427_s4 = inlined_call_operand.vmem [shape: f32[1,8], index: 4, kind: input, shape index: {}]   ;;  %s1428_s5 = inlined_call_operand.vmem [shape: bf16[512,8], index: 5, kind: output, shape index: {0}]   ;;  %s1429_s6 = inlined_call_operand.vmem [shape: f32[32,8], index: 6, kind: output, shape index: {1}]   ;;  %s1430_s7 = inlined_call_operand.vmem [shape: f32[32,8], index: 7, kind: output, shape index: {2}]  }
   0x1 LB: > { %s1156_s25 = sadd.s32 4294967295, %s1107_s24   ;;  %p946_p0 = scmp.ge.s32.totalorder %s1107_s24, 1  ;;  %s1107_s24 = sphi %s1150_s24, %s18_s24  }
   0x2   : > { %p243_p1 = scmp.lt.s32.totalorder %s1107_s24, 5 }
   0x4   : > { %p244_p2 = pnand %p946_p0, %p243_p1 }
   0x5   : > { %v1099_v0 = vld [vmem:[%s1426_s3] sm:$0xff] (!%p244_p2)   ;;  %s947_s28 = sshll.u32 (!%p244_p2), %s1156_s25, 4  ;;  %v1100_v1 = vld [vmem:[%s1426_s3 + $0x8] sm:$0xff] (!%p244_p2)   ;;  %vm429_vm0 = vcmask (!%p244_p2), 261120   ;;  %s982_s16 = sshll.u32 (!%p244_p2), %s1156_s25, 7  ;;  %vm615_vm2 = vcmask (!%p244_p2), 60416  }
   0x6   : > { %247 = sbr.rel (%p244_p2) target bundleno = 294 (0x126), region = 40  ;;  %p284_p3 = scmp.lt.s32.totalorder (!%p244_p2), %s947_s28, 63  ;;  %1066 = vmatprep.subr.bf16.mxu0 (!%p244_p2), %v1099_v0  ;;  %1086 = vmatprep.subr.bf16.mxu1 (!%p244_p2), %v1099_v0  ;;  %v1180_v2 = vld [vmem:[%s1424_s1] ss:$0 sm:$0xff] (!%p244_p2)  ;;  %vm731_vm10 = vcmask (!%p244_p2), 64512  }
   0x7   : > { %1067 = vmatpush3.bf16.msra.mxu0 (!%p244_p2), %v1099_v0  ;;  %1088 = vmatpush3.bf16.msra.mxu1 (!%p244_p2), %v1099_v0  ;;  %v1189_v11 = vld [vmem:[%s1425_s2] ss:$0 sm:$0xff] (!%p244_p2)  ;;  %p295_p4 = scmp.lt.s32.totalorder (!%p244_p2), %s1156_s25, 3 }
   0x8   : > { %1068 = vmatprep.subr.bf16.mxu0 (!%p244_p2), %v1100_v1  ;;  %1087 = vmatprep.subr.bf16.mxu1 (!%p244_p2), %v1100_v1 }
   0xb   : > { %1069 = vmatpush3.bf16.msra.mxu0 (!%p244_p2), %v1100_v1  ;;  %1089 = vmatpush3.bf16.msra.mxu1 (!%p244_p2), %v1100_v1 }
   0xd   : > { %s1432_s28 = smov (!%p284_p3, %s947_s28), 63  ;;  %s1434_s25 = smov (!%p295_p4, %s1156_s25), 3 }
   0xe   : > { %s948_s8 = sshll.u32 %s1432_s28, 2  ;;  %s951_s22 = sshll.u32 %s1434_s25, 3 }
   0xf   : > { %s1175_s11 = scalar_lea.vmem %s1423_s0, %s948_s8  ;;  %s1281_s21 = scalar_lea.vmem %s1428_s5, %s948_s8 }
  0x10   : > { %v1018_v3 = vld [vmem:[%s1175_s11] sm:$0xff]   ;;  %v1049_v4 = vld [vmem:[%s1175_s11 + $0x8] sm:$0xff]   ;;  %v1050_v5 = vld [vmem:[%s1175_s11 + $0x10] sm:$0xff]   ;;  %s298_s27 = scalar_lea.vmem %s1429_s6, %s951_s22  ;;  %s302_s30 = scalar_lea.vmem %s1430_s7, %s951_s22 }
  0x11   : > { %v1019_v6 = vunpack.c.l.bf16 %v1018_v3  ;;  %v1020_v7 = vunpack.c.h.bf16 %v1018_v3  ;;  %v1023_v8 = vunpack.c.l.bf16 %v1049_v4  ;;  %v1024_v9 = vunpack.c.h.bf16 %v1049_v4  ;;  %v1051_v10 = vld [vmem:[%s1175_s11 + $0x18] sm:$0xff]   ;;  %v1052_v32 = vld [vmem:[%s1175_s11 + $0x20] sm:$0xff]   ;;  %v1053_v37 = vld [vmem:[%s1175_s11 + $0x28] sm:$0xff]  }
  0x12   : > { %v1027_v12 = vunpack.c.l.bf16 %v1050_v5  ;;  %v1028_v13 = vunpack.c.h.bf16 %v1050_v5  ;;  %v1031_v14 = vunpack.c.l.bf16 %v1051_v10  ;;  %v1032_v15 = vunpack.c.h.bf16 %v1051_v10  ;;  %v1054_v42 = vld [vmem:[%s1175_s11 + $0x30] sm:$0xff]   ;;  %v1055_v47 = vld [vmem:[%s1175_s11 + $0x38] sm:$0xff]  }
  0x13   : > { %v343_v16 = vmul.f32 %v1019_v6, %v1180_v2  ;;  %v344_v17 = vmul.f32 %v1020_v7, %v1180_v2  ;;  %v345_v18 = vmul.f32 %v1023_v8, %v1180_v2  ;;  %v346_v19 = vmul.f32 %v1024_v9, %v1180_v2 }
  0x14   : > { %v347_v20 = vmul.f32 %v1027_v12, %v1180_v2  ;;  %v348_v21 = vmul.f32 %v1028_v13, %v1180_v2  ;;  %v349_v22 = vmul.f32 %v1031_v14, %v1180_v2  ;;  %v350_v23 = vmul.f32 %v1032_v15, %v1180_v2 }
  0x15   : > { %v366_v24 = vadd.f32 %v1189_v11, %v343_v16  ;;  %v367_v25 = vadd.f32 %v1189_v11, %v344_v17  ;;  %v368_v26 = vadd.f32 %v1189_v11, %v345_v18  ;;  %v369_v27 = vadd.f32 %v1189_v11, %v346_v19 }
  0x16   : > { %v370_v28 = vadd.f32 %v1189_v11, %v347_v20  ;;  %v371_v29 = vadd.f32 %v1189_v11, %v348_v21  ;;  %v372_v30 = vadd.f32 %v1189_v11, %v349_v22  ;;  %v373_v31 = vadd.f32 %v1189_v11, %v350_v23 }
  0x17   : > { %v382_v33 = vmax.f32 %v366_v24, 0.0  ;;  %v383_v34 = vmax.f32 %v367_v25, 0.0  ;;  %v384_v35 = vmax.f32 %v368_v26, 0.0  ;;  %v385_v36 = vmax.f32 %v369_v27, 0.0 }
  0x18   : > { %v386_v38 = vmax.f32 %v370_v28, 0.0  ;;  %v387_v39 = vmax.f32 %v371_v29, 0.0  ;;  %v388_v40 = vmax.f32 %v372_v30, 0.0  ;;  %v389_v41 = vmax.f32 %v373_v31, 0.0 }
  0x19   : > { %v398_v43 = vpack.c.bf16 %v383_v34, %v382_v33  ;;  %v399_v44 = vpack.c.bf16 %v385_v36, %v384_v35  ;;  %v1035_v45 = vunpack.c.l.bf16 %v1052_v32  ;;  %v1036_v46 = vunpack.c.h.bf16 %v1052_v32 }
  0x1a   : > { %v400_v48 = vpack.c.bf16 %v387_v39, %v386_v38  ;;  %v401_v49 = vpack.c.bf16 %v389_v41, %v388_v40  ;;  %v1039_v50 = vunpack.c.l.bf16 %v1053_v37  ;;  %v1040_v51 = vunpack.c.h.bf16 %v1053_v37 }
  0x1b   : > { %1070 = vmatprep.mubr.msk.bf16.mxu0 %vm429_vm0, %v398_v43  ;;  %v351_v52 = vmul.f32 %v1035_v45, %v1180_v2  ;;  %v352_v53 = vmul.f32 %v1036_v46, %v1180_v2  ;;  %v1043_v54 = vunpack.c.l.bf16 %v1054_v42  ;;  %v1044_v55 = vunpack.c.h.bf16 %v1054_v42 }
  0x1c   : > { %1071 = vmatmul.mubr.msk.bf16.vlgmr.msra.gmra.mrb[0].mxu0 %vm429_vm0, %v399_v44  ;;  %v353_v56 = vmul.f32 %v1039_v50, %v1180_v2  ;;  %v354_v57 = vmul.f32 %v1040_v51, %v1180_v2  ;;  %v1047_v58 = vunpack.c.l.bf16 %v1055_v47  ;;  %v1048_v59 = vunpack.c.h.bf16 %v1055_v47 }
  0x1d   : > { %1074 = vmatprep.mubr.msk.bf16.mxu0 %vm429_vm0, %v400_v48  ;;  %v374_v60 = vadd.f32 %v1189_v11, %v351_v52  ;;  %v375_v61 = vadd.f32 %v1189_v11, %v352_v53  ;;  %v355_v62 = vmul.f32 %v1043_v54, %v1180_v2  ;;  %v356_v63 = vmul.f32 %v1044_v55, %v1180_v2  ;;  %v1254_v48 = vld [vmem:[%s1427_s4] ss:$0 sm:$0xff] }
  0x1e   : > { %v376_v0 = vadd.f32 %v1189_v11, %v353_v56  ;;  %v377_v1 = vadd.f32 %v1189_v11, %v354_v57  ;;  %v357_v3 = vmul.f32 %v1047_v58, %v1180_v2  ;;  %v358_v4 = vmul.f32 %v1048_v59, %v1180_v2 }
  0x1f   : > { %v390_v5 = vmax.f32 %v374_v60, 0.0  ;;  %v391_v6 = vmax.f32 %v375_v61, 0.0  ;;  %v378_v7 = vadd.f32 %v1189_v11, %v355_v62  ;;  %v379_v8 = vadd.f32 %v1189_v11, %v356_v63 }
  0x20   : > { %v392_v9 = vmax.f32 %v376_v0, 0.0  ;;  %v393_v10 = vmax.f32 %v377_v1, 0.0  ;;  %v380_v12 = vadd.f32 %v1189_v11, %v357_v3  ;;  %v381_v13 = vadd.f32 %v1189_v11, %v358_v4 }
  0x21   : > { %v402_v14 = vpack.c.bf16 %v391_v6, %v390_v5  ;;  %v394_v15 = vmax.f32 %v378_v7, 0.0  ;;  %v395_v16 = vmax.f32 %v379_v8, 0.0  ;;  %v632_v11 = vlaneseq }
  0x22   : > { %v403_v17 = vpack.c.bf16 %v393_v10, %v392_v9  ;;  %v396_v18 = vmax.f32 %v380_v12, 0.0  ;;  %v397_v19 = vmax.f32 %v381_v13, 0.0  ;;  %v1236_v23 = vstv %s982_s16 }
  0x23   : > { %1078 = vmatprep.mubr.msk.bf16.mxu1 %vm429_vm0, %v402_v14  ;;  %v404_v2 = vpack.c.bf16 %v395_v16, %v394_v15  ;;  %v633_v21 = vshrl.u32 %v632_v11, 7  ;;  %v1109_v43 = vmov 0.0  }
  0x24   : > { %1075 = vmatmul.mubr.msk.bf16.gmra.mrb[4].mxu0 %vm429_vm0, %v401_v49  ;;  %1079 = vmatmul.mubr.msk.bf16.vlgmr.msra.gmra.mrb[0].mxu1 %vm429_vm0, %v403_v17  ;;  %v405_v20 = vpack.c.bf16 %v397_v19, %v396_v18 }
  0x25   : > { %1082 = vmatprep.mubr.msk.bf16.mxu1 %vm429_vm0, %v404_v2  ;;  %v635_v22 = vadd.s32 16, %v633_v21  ;;  %v636_v25 = vadd.s32 24, %v633_v21  ;;  %v634_v26 = vadd.s32 8, %v633_v21  ;;  %v639_v27 = vadd.s32 48, %v633_v21 }
  0x26   : > { %v637_v28 = vadd.s32 32, %v633_v21  ;;  %v640_v29 = vadd.s32 56, %v633_v21  ;;  %v638_v30 = vadd.s32 40, %v633_v21  ;;  %v643_v31 = vadd.s32 80, %v633_v21 }
  0x27   : > { %v653_v24 = vadd.s32 %v1236_v23, %v635_v22  ;;  %v651_v32 = vadd.s32 %v1236_v23, %v633_v21  ;;  %v654_v33 = vadd.s32 %v1236_v23, %v636_v25  ;;  %v652_v34 = vadd.s32 %v1236_v23, %v634_v26 }
  0x28   : > { %v657_v35 = vadd.s32 %v1236_v23, %v639_v27  ;;  %v655_v36 = vadd.s32 %v1236_v23, %v637_v28  ;;  %v641_v37 = vadd.s32 64, %v633_v21  ;;  %v658_v38 = vadd.s32 %v1236_v23, %v640_v29 }
  0x29   : > { %vm669_vm1 = vcmp.lt.s32.totalorder %v653_v24, 512  ;;  %v656_v39 = vadd.s32 %v1236_v23, %v638_v30  ;;  %v644_v40 = vadd.s32 88, %v633_v21  ;;  %v642_v41 = vadd.s32 72, %v633_v21 }
  0x2a   : > { %v661_v42 = vadd.s32 %v1236_v23, %v643_v31  ;;  %v985_v44 = vsel %vm669_vm1, 1.0, %v1109_v43  ;;  %vm667_vm3 = vcmp.lt.s32.totalorder %v651_v32, 512  ;;  %vm670_vm4 = vcmp.lt.s32.totalorder %v654_v33, 512 }
  0x2b   : > { %vm668_vm5 = vcmp.lt.s32.totalorder %v652_v34, 512  ;;  %vm673_vm6 = vcmp.lt.s32.totalorder %v657_v35, 512  ;;  %vm671_vm7 = vcmp.lt.s32.totalorder %v655_v36, 512  ;;  %v659_v45 = vadd.s32 %v1236_v23, %v641_v37 }
  0x2c   : > { %1083 = vmatmul.mubr.msk.bf16.gmra.mrb[4].mxu1 %vm429_vm0, %v405_v20  ;;  %vm674_vm8 = vcmp.lt.s32.totalorder %v658_v38, 512  ;;  %vm672_vm9 = vcmp.lt.s32.totalorder %v656_v39, 512  ;;  %v662_v46 = vadd.s32 %v1236_v23, %v644_v40  ;;  %v660_v47 = vadd.s32 %v1236_v23, %v642_v41 }
  0x2d   : > { %v983_v49 = vsel %vm667_vm3, 1.0, %v1109_v43  ;;  %vm677_vm11 = vcmp.lt.s32.totalorder %v661_v42, 512  ;;  %v647_v50 = vadd.s32 112, %v633_v21  ;;  %v986_v51 = vsel %vm670_vm4, 1.0, %v1109_v43 }
  0x2e   : > { %v984_v52 = vsel %vm668_vm5, 1.0, %v1109_v43  ;;  %v1260_v53 = vsel %vm673_vm6, 1.0, %v1109_v43  ;;  %v645_v54 = vadd.s32 96, %v633_v21  ;;  %v1264_v56 = vsel %vm671_vm7, 1.0, %v1109_v43 }
  0x2f   : > { %v1267_v57 = vsel %vm674_vm8, 1.0, %v1109_v43  ;;  %v1270_v58 = vsel %vm672_vm9, 1.0, %v1109_v43  ;;  %vm675_vm12 = vcmp.lt.s32.totalorder %v659_v45, 512  ;;  %v1274_v61 = vsel %vm677_vm11, 1.0, %v1109_v43 }
  0x30   : > { %vm678_vm13 = vcmp.lt.s32.totalorder %v662_v46, 512  ;;  %vm676_vm14 = vcmp.lt.s32.totalorder %v660_v47, 512  ;;  %v1285_v0 = vadd.s32 %v1236_v23, %v647_v50  ;;  %v648_v1 = vadd.s32 120, %v633_v21 }
  0x31   : > { %v646_v3 = vadd.s32 104, %v633_v21  ;;  %v1289_v8 = vadd.s32 %v1236_v23, %v645_v54  ;;  %v1294_v13 = vsel %vm675_vm12, 1.0, %v1109_v43  ;;  %v1300_v17 = vsel %vm678_vm13, 1.0, %v1109_v43 }
  0x32   : > { %v1306_v20 = vsel %vm676_vm14, 1.0, %v1109_v43  ;;  %vm681_vm15 = vcmp.lt.s32.totalorder %v1285_v0, 512  ;;  %v1313_v11 = vadd.s32 %v1236_v23, %v648_v1 }
  0x33   : > { %vm679_vm0 = vcmp.lt.s32.totalorder %v1289_v8, 512  ;;  %v1316_v21 = vadd.s32 %v1236_v23, %v646_v3 }
  0x34   : > { %vm682_vm1 = vcmp.lt.s32.totalorder %v1313_v11, 512  ;;  %v995_v0 = vsel %vm679_vm0, 1.0, %v1109_v43 }
  0x35   : > { %vm680_vm3 = vcmp.lt.s32.totalorder %v1316_v21, 512 }
  0xef   : > { %v1072_v55 = vpop.f32.mrb[0].mxu0 }
  0xf0   : > { %v497_v59 = vadd.f32 %v1072_v55, %v1254_v48  ;;  %v488_v60 = vpop.f32.mrb[1].mxu0 }
  0xf1   : > { %v489_v62 = vadd.f32 %v1254_v48, %v488_v60  ;;  %v1073_v63 = vpop.f32.mrb[2].mxu0 }
  0xf2   : > { %v1003_v4 = vpack.c.bf16 %v497_v59, %v497_v59  ;;  %v717_v5 = vmul.f32 %v985_v44, %v497_v59  ;;  %v500_v6 = vadd.f32 %v1073_v63, %v1254_v48  ;;  %v491_v7 = vpop.f32.mrb[3].mxu0 }
  0xf3   : > { %v1001_v9 = vpack.c.bf16 %v489_v62, %v489_v62  ;;  %v715_v10 = vmul.f32 %v983_v49, %v489_v62  ;;  %v492_v12 = vadd.f32 %v1254_v48, %v491_v7 }
  0xf4   : > { %618 = vst.msk [vmem:[%s1281_s21 + $0x8] sm:$0xf] %vm615_vm2, %v1003_v4  ;;  %v772_v14 = vmul.f32 %v717_v5, %v497_v59  ;;  %v1004_v15 = vpack.c.bf16 %v500_v6, %v500_v6  ;;  %v718_v16 = vmul.f32 %v986_v51, %v500_v6  ;;  %v735_v22 = vsel %vm731_vm10, %v717_v5, 0.0 }
  0xf5   : > { %616 = vst.msk [vmem:[%s1281_s21] sm:$0xf] %vm615_vm2, %v1001_v9  ;;  %v770_v2 = vmul.f32 %v715_v10, %v489_v62  ;;  %v1002_v18 = vpack.c.bf16 %v492_v12, %v492_v12  ;;  %v716_v19 = vmul.f32 %v984_v52, %v492_v12  ;;  %v732_v24 = vsel %vm731_vm10, %v715_v10, 0.0 }
  0xf6   : > { %619 = vst.msk [vmem:[%s1281_s21 + $0xc] sm:$0xf] %vm615_vm2, %v1004_v15  ;;  %v789_v29 = vsel %vm731_vm10, %v772_v14, 0.0  ;;  %v773_v30 = vmul.f32 %v718_v16, %v500_v6  ;;  %v737_v35 = vsel %vm731_vm10, %v718_v16, 0.0  ;;  %v997_v10 = vsel %vm681_vm15, 1.0, %v1109_v43 }
  0xf7   : > { %617 = vst.msk [vmem:[%s1281_s21 + $0x4] sm:$0xf] %vm615_vm2, %v1002_v18  ;;  %v733_v25 = vsel %vm731_vm10, %v716_v19, 0.0  ;;  %v771_v26 = vmul.f32 %v716_v19, %v492_v12  ;;  %v1076_v27 = vpop.f32.mrb[4].mxu0  ;;  %v1080_v28 = vpop.f32.mrb[0].mxu1  ;;  %v786_v34 = vsel %vm731_vm10, %v770_v2, 0.0 }
  0xf8   : > { %v734_v31 = vadd.f32 %v733_v25, %v732_v24  ;;  %v513_v32 = vadd.f32 %v1076_v27, %v1254_v48  ;;  %v504_v33 = vpop.f32.mrb[5].mxu0  ;;  %v520_v23 = vpop.f32.mrb[1].mxu1  ;;  %v791_v52 = vsel %vm731_vm10, %v773_v30, 0.0  ;;  %v529_v59 = vadd.f32 %v1080_v28, %v1254_v48 }
  0xf9   : > { %v787_v36 = vsel %vm731_vm10, %v771_v26, 0.0  ;;  %v505_v37 = vadd.f32 %v1254_v48, %v504_v33  ;;  %v1077_v38 = vpop.f32.mrb[6].mxu0  ;;  %v1081_v39 = vpop.f32.mrb[2].mxu1  ;;  %v521_v62 = vadd.f32 %v1254_v48, %v520_v23 }
  0xfa   : > { %v736_v40 = vadd.f32 %v735_v22, %v734_v31  ;;  %v788_v41 = vadd.f32 %v787_v36, %v786_v34  ;;  %v1007_v42 = vpack.c.bf16 %v513_v32, %v513_v32  ;;  %v721_v44 = vmul.f32 %v1260_v53, %v513_v32  ;;  %v507_v45 = vpop.f32.mrb[7].mxu0  ;;  %v523_v46 = vpop.f32.mrb[3].mxu1 }
  0xfb   : > { %v1005_v47 = vpack.c.bf16 %v505_v37, %v505_v37  ;;  %v719_v49 = vmul.f32 %v1264_v56, %v505_v37  ;;  %v516_v50 = vadd.f32 %v1077_v38, %v1254_v48  ;;  %v508_v51 = vadd.f32 %v1254_v48, %v507_v45 }
  0xfc   : > { %v790_v54 = vadd.f32 %v789_v29, %v788_v41  ;;  %622 = vst.msk [vmem:[%s1281_s21 + $0x18] sm:$0xf] %vm615_vm2, %v1007_v42  ;;  %v738_v55 = vadd.f32 %v737_v35, %v736_v40  ;;  %v776_v63 = vmul.f32 %v721_v44, %v513_v32  ;;  %v1011_v14 = vpack.c.bf16 %v529_v59, %v529_v59 }
  0xfd   : > { %620 = vst.msk [vmem:[%s1281_s21 + $0x10] sm:$0xf] %vm615_vm2, %v1005_v47  ;;  %v739_v53 = vsel %vm731_vm10, %v719_v49, 0.0  ;;  %v774_v56 = vmul.f32 %v719_v49, %v505_v37  ;;  %v1008_v60 = vpack.c.bf16 %v516_v50, %v516_v50  ;;  %v1006_v4 = vpack.c.bf16 %v508_v51, %v508_v51 }
  0xfe   : > { %v740_v1 = vadd.f32 %v739_v53, %v738_v55  ;;  %v792_v3 = vadd.f32 %v791_v52, %v790_v54  ;;  %v722_v6 = vmul.f32 %v1267_v57, %v516_v50  ;;  %v720_v7 = vmul.f32 %v1270_v58, %v508_v51  ;;  %626 = vst.msk [vmem:[%s1281_s21 + $0x28] sm:$0xf] %vm615_vm2, %v1011_v14 }
  0xff   : > { %v793_v5 = vsel %vm731_vm10, %v774_v56, 0.0  ;;  %623 = vst.msk [vmem:[%s1281_s21 + $0x1c] sm:$0xf] %vm615_vm2, %v1008_v60  ;;  %v1084_v9 = vpop.f32.mrb[4].mxu1  ;;  %621 = vst.msk [vmem:[%s1281_s21 + $0x14] sm:$0xf] %vm615_vm2, %v1006_v4  ;;  %v725_v15 = vmul.f32 %v1274_v61, %v529_v59  ;;  %v1009_v16 = vpack.c.bf16 %v521_v62, %v521_v62  ;;  %v723_v58 = vmul.f32 %v1294_v13, %v521_v62 }
 0x100   : > { %v794_v12 = vadd.f32 %v793_v5, %v792_v3  ;;  %v536_v2 = vpop.f32.mrb[5].mxu1  ;;  %v741_v18 = vsel %vm731_vm10, %v720_v7, 0.0  ;;  %v775_v57 = vmul.f32 %v720_v7, %v508_v51  ;;  %v743_v22 = vsel %vm731_vm10, %v721_v44, 0.0 }
 0x101   : > { %v1085_v19 = vpop.f32.mrb[6].mxu1  ;;  %v797_v24 = vsel %vm731_vm10, %v776_v63, 0.0  ;;  %v742_v25 = vadd.f32 %v741_v18, %v740_v1  ;;  %624 = vst.msk [vmem:[%s1281_s21 + $0x20] sm:$0xf] %vm615_vm2, %v1009_v16  ;;  %v532_v61 = vadd.f32 %v1081_v39, %v1254_v48  ;;  %v745_v13 = vsel %vm731_vm10, %v722_v6, 0.0 }
 0x102   : > { %v539_v26 = vpop.f32.mrb[7].mxu1  ;;  %v777_v27 = vmul.f32 %v722_v6, %v516_v50  ;;  %v795_v8 = vsel %vm731_vm10, %v775_v57, 0.0  ;;  %v524_v28 = vadd.f32 %v1254_v48, %v523_v46  ;;  %v780_v31 = vmul.f32 %v725_v15, %v529_v59 }
 0x103   : > { %v744_v29 = vadd.f32 %v743_v22, %v742_v25  ;;  %v796_v30 = vadd.f32 %v795_v8, %v794_v12  ;;  %v1012_v32 = vpack.c.bf16 %v532_v61, %v532_v61  ;;  %v747_v33 = vsel %vm731_vm10, %v723_v58, 0.0 }
 0x104   : > { %v778_v23 = vmul.f32 %v723_v58, %v521_v62  ;;  %v1010_v34 = vpack.c.bf16 %v524_v28, %v524_v28  ;;  %v724_v35 = vmul.f32 %v1306_v20, %v524_v28  ;;  %v545_v38 = vadd.f32 %v1084_v9, %v1254_v48 }
 0x105   : > { %v798_v36 = vadd.f32 %v797_v24, %v796_v30  ;;  %v746_v37 = vadd.f32 %v745_v13, %v744_v29  ;;  %627 = vst.msk [vmem:[%s1281_s21 + $0x2c] sm:$0xf] %vm615_vm2, %v1012_v32  ;;  %v537_v39 = vadd.f32 %v1254_v48, %v536_v2  ;;  %v799_v40 = vsel %vm731_vm10, %v777_v27, 0.0 }
 0x106   : > { %v726_v41 = vmul.f32 %v1300_v17, %v532_v61  ;;  %625 = vst.msk [vmem:[%s1281_s21 + $0x24] sm:$0xf] %vm615_vm2, %v1010_v34  ;;  %v779_v42 = vmul.f32 %v724_v35, %v524_v28  ;;  %v998_v20 = vsel %vm682_vm1, 1.0, %v1109_v43  ;;  %v1015_v46 = vpack.c.bf16 %v545_v38, %v545_v38 }
 0x107   : > { %v748_v44 = vadd.f32 %v747_v33, %v746_v37  ;;  %v800_v45 = vadd.f32 %v799_v40, %v798_v36  ;;  %v996_v47 = vsel %vm680_vm3, 1.0, %v1109_v43  ;;  %v801_v49 = vsel %vm731_vm10, %v778_v23, 0.0 }
 0x108   : > { %v749_v17 = vsel %vm731_vm10, %v724_v35, 0.0  ;;  %v1013_v50 = vpack.c.bf16 %v537_v39, %v537_v39  ;;  %v727_v51 = vmul.f32 %v995_v0, %v537_v39  ;;  %v751_v52 = vsel %vm731_vm10, %v725_v15, 0.0  ;;  %630 = vst.msk [vmem:[%s1281_s21 + $0x38] sm:$0xf] %vm615_vm2, %v1015_v46 }
 0x109   : > { %v805_v54 = vsel %vm731_vm10, %v780_v31, 0.0  ;;  %v802_v11 = vadd.f32 %v801_v49, %v800_v45  ;;  %v750_v55 = vadd.f32 %v749_v17, %v748_v44  ;;  %v781_v59 = vmul.f32 %v726_v41, %v532_v61 }
 0x10a   : > { %v803_v53 = vsel %vm731_vm10, %v779_v42, 0.0  ;;  %628 = vst.msk [vmem:[%s1281_s21 + $0x30] sm:$0xf] %vm615_vm2, %v1013_v50  ;;  %v548_v43 = vadd.f32 %v1085_v19, %v1254_v48  ;;  %v540_v21 = vadd.f32 %v1254_v48, %v539_v26  ;;  %v753_v56 = vsel %vm731_vm10, %v726_v41, 0.0 }
 0x10b   : > { %v752_v60 = vadd.f32 %v751_v52, %v750_v55  ;;  %v804_v62 = vadd.f32 %v803_v53, %v802_v11  ;;  %v729_v63 = vmul.f32 %v997_v10, %v545_v38  ;;  %v755_v1 = vsel %vm731_vm10, %v727_v51, 0.0 }
 0x10c   : > { %v782_v3 = vmul.f32 %v727_v51, %v537_v39  ;;  %v1016_v4 = vpack.c.bf16 %v548_v43, %v548_v43  ;;  %v1014_v5 = vpack.c.bf16 %v540_v21, %v540_v21  ;;  %v728_v9 = vmul.f32 %v996_v47, %v540_v21 }
 0x10d   : > { %v806_v6 = vadd.f32 %v805_v54, %v804_v62  ;;  %v754_v7 = vadd.f32 %v753_v56, %v752_v60  ;;  %v807_v12 = vsel %vm731_vm10, %v781_v59, 0.0  ;;  %v730_v14 = vmul.f32 %v998_v20, %v548_v43 }
 0x10e   : > { %631 = vst.msk [vmem:[%s1281_s21 + $0x3c] sm:$0xf] %vm615_vm2, %v1016_v4  ;;  %629 = vst.msk [vmem:[%s1281_s21 + $0x34] sm:$0xf] %vm615_vm2, %v1014_v5  ;;  %v783_v16 = vmul.f32 %v728_v9, %v540_v21  ;;  %v784_v10 = vmul.f32 %v729_v63, %v545_v38  ;;  %v809_v2 = vsel %vm731_vm10, %v782_v3, 0.0  ;;  %v757_v18 = vsel %vm731_vm10, %v728_v9, 0.0 }
 0x10f   : > { %v756_v48 = vadd.f32 %v755_v1, %v754_v7  ;;  %v808_v15 = vadd.f32 %v807_v12, %v806_v6  ;;  %v759_v0 = vsel %vm731_vm10, %v729_v63, 0.0  ;;  %v785_v19 = vmul.f32 %v730_v14, %v548_v43 }
 0x110   : > { %v811_v22 = vsel %vm731_vm10, %v783_v16, 0.0  ;;  %v813_v61 = vsel %vm731_vm10, %v784_v10, 0.0  ;;  %v761_v26 = vsel %vm731_vm10, %v730_v14, 0.0 }
 0x111   : > { %v810_v57 = vadd.f32 %v809_v2, %v808_v15  ;;  %v758_v58 = vadd.f32 %v757_v18, %v756_v48  ;;  %v815_v8 = vsel %vm731_vm10, %v785_v19, 0.0 }
 0x113   : > { %v760_v24 = vadd.f32 %v759_v0, %v758_v58  ;;  %v812_v25 = vadd.f32 %v811_v22, %v810_v57 }
 0x115   : > { %v762_v13 = vadd.f32 %v761_v26, %v760_v24  ;;  %v814_v27 = vadd.f32 %v813_v61, %v812_v25 }
 0x117   : > { %v763_v28 = vrot.slane %v762_v13, 4  ;;  %v816_v29 = vadd.f32 %v815_v8, %v814_v27 }
 0x119   : > { %v764_v30 = vadd.f32 %v763_v28, %v762_v13  ;;  %v817_v31 = vrot.slane %v816_v29, 4 }
 0x11b   : > { %v765_v32 = vrot.slane %v764_v30, 2  ;;  %v818_v33 = vadd.f32 %v817_v31, %v816_v29 }
 0x11d   : > { %v766_v23 = vadd.f32 %v765_v32, %v764_v30  ;;  %v819_v34 = vrot.slane %v818_v33, 2 }
 0x11f   : > { %v767_v35 = vrot.slane %v766_v23, 1  ;;  %v820_v36 = vadd.f32 %v819_v34, %v818_v33 }
 0x121   : > { %v768_v37 = vadd.f32 %v767_v35, %v766_v23  ;;  %v821_v38 = vrot.slane %v820_v36, 1 }
 0x123   : > { %769 = vst.msk [vmem:[%s298_s27] sm:$0xff] %vm731_vm10, %v768_v37  ;;  %v822_v39 = vadd.f32 %v821_v38, %v820_v36 }
 0x125   : > { %823 = vst.msk [vmem:[%s302_s30] sm:$0xff] %vm731_vm10, %v822_v39 }
 0x126 PF: > { %s18_s24 = sadd.s32 1, %s1107_s24  }
 0x127   : > { %p15_p5 = scmp.ge.s32.totalorder %s18_s24, 6  }
 0x129   :  { %17 = sbr.rel (!%p15_p5) target bundleno = 1 (0x1), region = 94 }

</bundles_post_ra>
